<compile_context>
chip_gen: v7x
topology: tpu7x:2x2x1
jax: 0.10.0
libtpu: 0.0.40
codegen_flags: <defaults>
</compile_context>

<pallas_src>
import functools

import jax
import jax.numpy as jnp
from jax import lax
from jax.experimental import pallas as pl
from jax.experimental.pallas import tpu as pltpu


def _round_up(x, m):
    return (x + m - 1) // m * m


def _embedding_gather_kernel(ids_ref, pos_ref, table_hbm, o_ref, gbuf, sem,
                             *, ts, cs, n_chunks, s_pad):
    b = pl.program_id(0)
    s0 = pl.program_id(1) * ts
    tok0 = b * s_pad + s0                    # first flat token index of this tile

    unroll = 8

    def issue_chunk(base, slot):
        # Issue cs row-gather DMAs (table row -> gbuf[slot, t]) that all signal
        # sem[slot].  Unrolled by 8 so descriptor pushes co-issue.
        def body(g, carry):
            t0 = g * unroll
            for u in range(unroll):
                t = t0 + u
                row = ids_ref[tok0 + base + t]
                pltpu.make_async_copy(
                    table_hbm.at[pl.ds(row, 1), :],
                    gbuf.at[slot, pl.ds(t, 1), :],
                    sem.at[slot],
                ).start()
            return carry

        lax.fori_loop(0, cs // unroll, body, 0)

    # Prime chunk 0, then per chunk: issue next chunk, single aggregate wait on
    # the current one, add positional rows, store the lane-dense slab.
    issue_chunk(0, 0)
    for c in range(n_chunks):
        slot = c & 1
        if c + 1 < n_chunks:
            issue_chunk((c + 1) * cs, 1 - slot)
        # One wait covering the whole (cs, D) chunk buffer: the cs per-row DMAs
        # above all signal sem[slot] and their byte counts sum to exactly this.
        pltpu.make_async_copy(gbuf.at[slot], gbuf.at[slot], sem.at[slot]).wait()
        rows = pl.ds(c * cs, cs)
        o_ref[0, rows, :] = gbuf[slot] + pos_ref[rows, :]


def make_pos_mat(seq_len, d_model, C, dtype=jnp.float32):
    """Exact JAX replica of the PyTorch double loop in __init__."""
    pos = jnp.arange(seq_len, dtype=jnp.float32)[:, None] + 1.0        # (S, 1)
    j = jnp.arange(d_model)                                            # (D,)
    expo = ((j + 1) // 2).astype(jnp.float32) / float(d_model)         # (D,)
    angle = pos / jnp.power(jnp.float32(C), expo)                      # (S, D)
    # (j + 1) % 2 truthy  <=>  j even  ->  sin; else cos (matches the module).
    pos_mat = jnp.where((j % 2) == 0, jnp.sin(angle), jnp.cos(angle))
    return pos_mat.astype(dtype)


def embedding_pallas(token_ids, table, pos_mat, *, max_rows_per_tile=512,
                     use_core_parallel=False):
    """token_ids: [B, S] int; table: [V, D]; pos_mat: [S, D] -> [B, S, D]."""
    B, S = token_ids.shape
    V, D = table.shape
    assert pos_mat.shape == (S, D)
    assert D % 128 == 0, "d_model must be a multiple of 128 for lane-dense tiles"

    # Seq-tile size, multiple of 32 so the gather chunks stay sublane-aligned.
    ts = min(_round_up(max_rows_per_tile, 32), _round_up(S, 32))
    s_pad = _round_up(S, ts)
    n_s = s_pad // ts
    n_chunks = 4 if ts >= 128 else 2          # intra-step double-buffer depth
    cs = ts // n_chunks
    assert cs % 8 == 0 and cs * n_chunks == ts

    # Pad ids with 0 (harmless gather of row 0) and pos rows to padded seq len.
    ids_flat = jnp.pad(token_ids.astype(jnp.int32),
                       ((0, 0), (0, s_pad - S))).reshape(B * s_pad)
    pos_padded = jnp.pad(pos_mat.astype(table.dtype), ((0, s_pad - S), (0, 0)))

    kernel = functools.partial(_embedding_gather_kernel,
                               ts=ts, cs=cs, n_chunks=n_chunks, s_pad=s_pad)

    bytes_el = table.dtype.itemsize
    cost = pl.CostEstimate(
        flops=B * s_pad * D,                                  # one add per elem
        transcendentals=0,
        bytes_accessed=(2 * B * s_pad * D + s_pad * D) * bytes_el
                       + B * s_pad * 4,
    )

    # On v7x, flip use_core_parallel=True so the two TensorCores split the
    # batch axis (each gets its own scalar unit / DMA issue path).
    batch_sem = pltpu.CORE_PARALLEL if use_core_parallel else pltpu.PARALLEL

    out = pl.pallas_call(
        kernel,
        out_shape=jax.ShapeDtypeStruct((B, s_pad, D), table.dtype),
        grid_spec=pltpu.PrefetchScalarGridSpec(
            num_scalar_prefetch=1,                            # ids -> SMEM
            grid=(B, n_s),
            in_specs=[
                pl.BlockSpec((ts, D), lambda b, s, ids: (s, 0)),   # pos rows
                pl.BlockSpec(memory_space=pl.ANY),                 # table (HBM)
            ],
            out_specs=pl.BlockSpec((1, ts, D), lambda b, s, ids: (b, s, 0)),
            scratch_shapes=[
                pltpu.VMEM((2, cs, D), table.dtype),     # chunk double buffer
                pltpu.SemaphoreType.DMA((2,)),           # one DMA sem per slot
            ],
        ),
        compiler_params=pltpu.CompilerParams(
            dimension_semantics=(batch_sem, pltpu.ARBITRARY)),
        cost_estimate=cost,
    )(ids_flat, pos_padded, table)

    return out[:, :S, :]


def embedding_reference(token_ids, table, pos_mat):
    return table[token_ids] + pos_mat[None, :, :]


if __name__ == "__main__":
    # Small shapes consistent with the module: seq_len=40, d_model=512,
    # C=10000, batch=2, small vocab for the test.
    batch, seq_len, d_model, vocab_size, C = 2, 40, 512, 2048, 10000

    key = jax.random.PRNGKey(0)
    k_ids, k_tab = jax.random.split(key)

    token_ids = jax.random.randint(
        k_ids, (batch, seq_len), 0, vocab_size, dtype=jnp.int32)
    table = jax.random.normal(k_tab, (vocab_size, d_model), dtype=jnp.float32)
    pos_mat = make_pos_mat(seq_len, d_model, C)

    out = embedding_pallas(token_ids, table, pos_mat)
    out = jax.block_until_ready(out)

    ref = embedding_reference(token_ids, table, pos_mat)
    assert out.shape == (batch, seq_len, d_model)
    assert jnp.allclose(out, ref, atol=1e-6, rtol=1e-6), "mismatch vs reference"

    print("KERNEL_OK")
</pallas_src>

<mosaic_0001>
module attributes {stable_mosaic.version = 11 : i64} {
  func.func @_embedding_gather_kernel(%arg0: i32, %arg1: i32, %arg2: memref<128xi32, #tpu.memory_space<smem>>, %arg3: memref<64x512xf32, #tpu.memory_space<vmem>>, %arg4: memref<2048x512xf32, #tpu.memory_space<any>>, %arg5: memref<1x64x512xf32, #tpu.memory_space<vmem>>, %arg6: memref<2x32x512xf32, #tpu.memory_space<vmem>>, %arg7: memref<2x!tpu.dma_semaphore, #tpu.memory_space<semaphore_mem>>) attributes {dimension_semantics = [#tpu.dimension_semantics<parallel>, #tpu.dimension_semantics<arbitrary>], iteration_bounds = array<i64: 2, 1>, scalar_prefetch = 1 : i64, scratch_operands = 2 : i64, tpu.core_type = #tpu.core_type<tc>, window_params = [{transform_indices = @transform_0, window_bounds = array<i64: 64, 512>}, {}, {transform_indices = @transform_2, window_bounds = array<i64: 1, 64, 512>}]} {
    %c64_i32 = arith.constant 64 : i32
    %0 = arith.muli %arg1, %c64_i32 : i32
    %c64_i32_0 = arith.constant 64 : i32
    %1 = arith.muli %arg0, %c64_i32_0 : i32
    %2 = arith.addi %1, %0 : i32
    %c0_i32 = arith.constant 0 : i32
    %c4_i32 = arith.constant 4 : i32
    %3 = arith.addi %c0_i32, %c4_i32 : i32
    %c1_i32 = arith.constant 1 : i32
    scf.for %arg8 = %c0_i32 to %3 step %c1_i32  : i32 {
      %c8_i32 = arith.constant 8 : i32
      %31 = arith.muli %arg8, %c8_i32 : i32
      %c0_i32_33 = arith.constant 0 : i32
      %32 = arith.addi %31, %c0_i32_33 : i32
      %c0_i32_34 = arith.constant 0 : i32
      %33 = arith.addi %2, %c0_i32_34 : i32
      %34 = arith.addi %33, %32 : i32
      %35 = arith.index_cast %34 : i32 to index
      %36 = memref.load %arg2[%35] : memref<128xi32, #tpu.memory_space<smem>>
      %c0_i32_35 = arith.constant 0 : i32
      %c0_i32_36 = arith.constant 0 : i32
      %c0_i32_37 = arith.constant 0 : i32
      %37 = tpu.memref_slice %arg4[%36, %c0_i32_37] : memref<2048x512xf32, #tpu.memory_space<any>> -> memref<1x512xf32, #tpu.memory_space<any>>
      %c0_i32_38 = arith.constant 0 : i32
      %38 = tpu.memref_slice %arg6[%c0_i32_35, %32, %c0_i32_38] : memref<2x32x512xf32, #tpu.memory_space<vmem>> -> memref<1x1x512xf32, #tpu.memory_space<vmem>>
      %39 = tpu.memref_squeeze %38 : memref<1x1x512xf32, #tpu.memory_space<vmem>> -> memref<1x512xf32, #tpu.memory_space<vmem>>
      %40 = tpu.memref_slice %arg7[%c0_i32_36] : memref<2x!tpu.dma_semaphore, #tpu.memory_space<semaphore_mem>> -> memref<1x!tpu.dma_semaphore, #tpu.memory_space<semaphore_mem>>
      %41 = tpu.memref_squeeze %40 : memref<1x!tpu.dma_semaphore, #tpu.memory_space<semaphore_mem>> -> memref<!tpu.dma_semaphore, #tpu.memory_space<semaphore_mem>>
      tpu.enqueue_dma source(%37 : memref<1x512xf32, #tpu.memory_space<any>>) target(%39 : memref<1x512xf32, #tpu.memory_space<vmem>>) target_semaphore(%41 : memref<!tpu.dma_semaphore, #tpu.memory_space<semaphore_mem>>)
      %c1_i32_39 = arith.constant 1 : i32
      %42 = arith.addi %31, %c1_i32_39 : i32
      %c0_i32_40 = arith.constant 0 : i32
      %43 = arith.addi %2, %c0_i32_40 : i32
      %44 = arith.addi %43, %42 : i32
      %45 = arith.index_cast %44 : i32 to index
      %46 = memref.load %arg2[%45] : memref<128xi32, #tpu.memory_space<smem>>
      %c0_i32_41 = arith.constant 0 : i32
      %c0_i32_42 = arith.constant 0 : i32
      %c0_i32_43 = arith.constant 0 : i32
      %47 = tpu.memref_slice %arg4[%46, %c0_i32_43] : memref<2048x512xf32, #tpu.memory_space<any>> -> memref<1x512xf32, #tpu.memory_space<any>>
      %c0_i32_44 = arith.constant 0 : i32
      %48 = tpu.memref_slice %arg6[%c0_i32_41, %42, %c0_i32_44] : memref<2x32x512xf32, #tpu.memory_space<vmem>> -> memref<1x1x512xf32, #tpu.memory_space<vmem>>
      %49 = tpu.memref_squeeze %48 : memref<1x1x512xf32, #tpu.memory_space<vmem>> -> memref<1x512xf32, #tpu.memory_space<vmem>>
      %50 = tpu.memref_slice %arg7[%c0_i32_42] : memref<2x!tpu.dma_semaphore, #tpu.memory_space<semaphore_mem>> -> memref<1x!tpu.dma_semaphore, #tpu.memory_space<semaphore_mem>>
      %51 = tpu.memref_squeeze %50 : memref<1x!tpu.dma_semaphore, #tpu.memory_space<semaphore_mem>> -> memref<!tpu.dma_semaphore, #tpu.memory_space<semaphore_mem>>
      tpu.enqueue_dma source(%47 : memref<1x512xf32, #tpu.memory_space<any>>) target(%49 : memref<1x512xf32, #tpu.memory_space<vmem>>) target_semaphore(%51 : memref<!tpu.dma_semaphore, #tpu.memory_space<semaphore_mem>>)
      %c2_i32 = arith.constant 2 : i32
      %52 = arith.addi %31, %c2_i32 : i32
      %c0_i32_45 = arith.constant 0 : i32
      %53 = arith.addi %2, %c0_i32_45 : i32
      %54 = arith.addi %53, %52 : i32
      %55 = arith.index_cast %54 : i32 to index
      %56 = memref.load %arg2[%55] : memref<128xi32, #tpu.memory_space<smem>>
      %c0_i32_46 = arith.constant 0 : i32
      %c0_i32_47 = arith.constant 0 : i32
      %c0_i32_48 = arith.constant 0 : i32
      %57 = tpu.memref_slice %arg4[%56, %c0_i32_48] : memref<2048x512xf32, #tpu.memory_space<any>> -> memref<1x512xf32, #tpu.memory_space<any>>
      %c0_i32_49 = arith.constant 0 : i32
      %58 = tpu.memref_slice %arg6[%c0_i32_46, %52, %c0_i32_49] : memref<2x32x512xf32, #tpu.memory_space<vmem>> -> memref<1x1x512xf32, #tpu.memory_space<vmem>>
      %59 = tpu.memref_squeeze %58 : memref<1x1x512xf32, #tpu.memory_space<vmem>> -> memref<1x512xf32, #tpu.memory_space<vmem>>
      %60 = tpu.memref_slice %arg7[%c0_i32_47] : memref<2x!tpu.dma_semaphore, #tpu.memory_space<semaphore_mem>> -> memref<1x!tpu.dma_semaphore, #tpu.memory_space<semaphore_mem>>
      %61 = tpu.memref_squeeze %60 : memref<1x!tpu.dma_semaphore, #tpu.memory_space<semaphore_mem>> -> memref<!tpu.dma_semaphore, #tpu.memory_space<semaphore_mem>>
      tpu.enqueue_dma source(%57 : memref<1x512xf32, #tpu.memory_space<any>>) target(%59 : memref<1x512xf32, #tpu.memory_space<vmem>>) target_semaphore(%61 : memref<!tpu.dma_semaphore, #tpu.memory_space<semaphore_mem>>)
      %c3_i32 = arith.constant 3 : i32
      %62 = arith.addi %31, %c3_i32 : i32
      %c0_i32_50 = arith.constant 0 : i32
      %63 = arith.addi %2, %c0_i32_50 : i32
      %64 = arith.addi %63, %62 : i32
      %65 = arith.index_cast %64 : i32 to index
      %66 = memref.load %arg2[%65] : memref<128xi32, #tpu.memory_space<smem>>
      %c0_i32_51 = arith.constant 0 : i32
      %c0_i32_52 = arith.constant 0 : i32
      %c0_i32_53 = arith.constant 0 : i32
      %67 = tpu.memref_slice %arg4[%66, %c0_i32_53] : memref<2048x512xf32, #tpu.memory_space<any>> -> memref<1x512xf32, #tpu.memory_space<any>>
      %c0_i32_54 = arith.constant 0 : i32
      %68 = tpu.memref_slice %arg6[%c0_i32_51, %62, %c0_i32_54] : memref<2x32x512xf32, #tpu.memory_space<vmem>> -> memref<1x1x512xf32, #tpu.memory_space<vmem>>
      %69 = tpu.memref_squeeze %68 : memref<1x1x512xf32, #tpu.memory_space<vmem>> -> memref<1x512xf32, #tpu.memory_space<vmem>>
      %70 = tpu.memref_slice %arg7[%c0_i32_52] : memref<2x!tpu.dma_semaphore, #tpu.memory_space<semaphore_mem>> -> memref<1x!tpu.dma_semaphore, #tpu.memory_space<semaphore_mem>>
      %71 = tpu.memref_squeeze %70 : memref<1x!tpu.dma_semaphore, #tpu.memory_space<semaphore_mem>> -> memref<!tpu.dma_semaphore, #tpu.memory_space<semaphore_mem>>
      tpu.enqueue_dma source(%67 : memref<1x512xf32, #tpu.memory_space<any>>) target(%69 : memref<1x512xf32, #tpu.memory_space<vmem>>) target_semaphore(%71 : memref<!tpu.dma_semaphore, #tpu.memory_space<semaphore_mem>>)
      %c4_i32_55 = arith.constant 4 : i32
      %72 = arith.addi %31, %c4_i32_55 : i32
      %c0_i32_56 = arith.constant 0 : i32
      %73 = arith.addi %2, %c0_i32_56 : i32
      %74 = arith.addi %73, %72 : i32
      %75 = arith.index_cast %74 : i32 to index
      %76 = memref.load %arg2[%75] : memref<128xi32, #tpu.memory_space<smem>>
      %c0_i32_57 = arith.constant 0 : i32
      %c0_i32_58 = arith.constant 0 : i32
      %c0_i32_59 = arith.constant 0 : i32
      %77 = tpu.memref_slice %arg4[%76, %c0_i32_59] : memref<2048x512xf32, #tpu.memory_space<any>> -> memref<1x512xf32, #tpu.memory_space<any>>
      %c0_i32_60 = arith.constant 0 : i32
      %78 = tpu.memref_slice %arg6[%c0_i32_57, %72, %c0_i32_60] : memref<2x32x512xf32, #tpu.memory_space<vmem>> -> memref<1x1x512xf32, #tpu.memory_space<vmem>>
      %79 = tpu.memref_squeeze %78 : memref<1x1x512xf32, #tpu.memory_space<vmem>> -> memref<1x512xf32, #tpu.memory_space<vmem>>
      %80 = tpu.memref_slice %arg7[%c0_i32_58] : memref<2x!tpu.dma_semaphore, #tpu.memory_space<semaphore_mem>> -> memref<1x!tpu.dma_semaphore, #tpu.memory_space<semaphore_mem>>
      %81 = tpu.memref_squeeze %80 : memref<1x!tpu.dma_semaphore, #tpu.memory_space<semaphore_mem>> -> memref<!tpu.dma_semaphore, #tpu.memory_space<semaphore_mem>>
      tpu.enqueue_dma source(%77 : memref<1x512xf32, #tpu.memory_space<any>>) target(%79 : memref<1x512xf32, #tpu.memory_space<vmem>>) target_semaphore(%81 : memref<!tpu.dma_semaphore, #tpu.memory_space<semaphore_mem>>)
      %c5_i32 = arith.constant 5 : i32
      %82 = arith.addi %31, %c5_i32 : i32
      %c0_i32_61 = arith.constant 0 : i32
      %83 = arith.addi %2, %c0_i32_61 : i32
      %84 = arith.addi %83, %82 : i32
      %85 = arith.index_cast %84 : i32 to index
      %86 = memref.load %arg2[%85] : memref<128xi32, #tpu.memory_space<smem>>
      %c0_i32_62 = arith.constant 0 : i32
      %c0_i32_63 = arith.constant 0 : i32
      %c0_i32_64 = arith.constant 0 : i32
      %87 = tpu.memref_slice %arg4[%86, %c0_i32_64] : memref<2048x512xf32, #tpu.memory_space<any>> -> memref<1x512xf32, #tpu.memory_space<any>>
      %c0_i32_65 = arith.constant 0 : i32
      %88 = tpu.memref_slice %arg6[%c0_i32_62, %82, %c0_i32_65] : memref<2x32x512xf32, #tpu.memory_space<vmem>> -> memref<1x1x512xf32, #tpu.memory_space<vmem>>
      %89 = tpu.memref_squeeze %88 : memref<1x1x512xf32, #tpu.memory_space<vmem>> -> memref<1x512xf32, #tpu.memory_space<vmem>>
      %90 = tpu.memref_slice %arg7[%c0_i32_63] : memref<2x!tpu.dma_semaphore, #tpu.memory_space<semaphore_mem>> -> memref<1x!tpu.dma_semaphore, #tpu.memory_space<semaphore_mem>>
      %91 = tpu.memref_squeeze %90 : memref<1x!tpu.dma_semaphore, #tpu.memory_space<semaphore_mem>> -> memref<!tpu.dma_semaphore, #tpu.memory_space<semaphore_mem>>
      tpu.enqueue_dma source(%87 : memref<1x512xf32, #tpu.memory_space<any>>) target(%89 : memref<1x512xf32, #tpu.memory_space<vmem>>) target_semaphore(%91 : memref<!tpu.dma_semaphore, #tpu.memory_space<semaphore_mem>>)
      %c6_i32 = arith.constant 6 : i32
      %92 = arith.addi %31, %c6_i32 : i32
      %c0_i32_66 = arith.constant 0 : i32
      %93 = arith.addi %2, %c0_i32_66 : i32
      %94 = arith.addi %93, %92 : i32
      %95 = arith.index_cast %94 : i32 to index
      %96 = memref.load %arg2[%95] : memref<128xi32, #tpu.memory_space<smem>>
      %c0_i32_67 = arith.constant 0 : i32
      %c0_i32_68 = arith.constant 0 : i32
      %c0_i32_69 = arith.constant 0 : i32
      %97 = tpu.memref_slice %arg4[%96, %c0_i32_69] : memref<2048x512xf32, #tpu.memory_space<any>> -> memref<1x512xf32, #tpu.memory_space<any>>
      %c0_i32_70 = arith.constant 0 : i32
      %98 = tpu.memref_slice %arg6[%c0_i32_67, %92, %c0_i32_70] : memref<2x32x512xf32, #tpu.memory_space<vmem>> -> memref<1x1x512xf32, #tpu.memory_space<vmem>>
      %99 = tpu.memref_squeeze %98 : memref<1x1x512xf32, #tpu.memory_space<vmem>> -> memref<1x512xf32, #tpu.memory_space<vmem>>
      %100 = tpu.memref_slice %arg7[%c0_i32_68] : memref<2x!tpu.dma_semaphore, #tpu.memory_space<semaphore_mem>> -> memref<1x!tpu.dma_semaphore, #tpu.memory_space<semaphore_mem>>
      %101 = tpu.memref_squeeze %100 : memref<1x!tpu.dma_semaphore, #tpu.memory_space<semaphore_mem>> -> memref<!tpu.dma_semaphore, #tpu.memory_space<semaphore_mem>>
      tpu.enqueue_dma source(%97 : memref<1x512xf32, #tpu.memory_space<any>>) target(%99 : memref<1x512xf32, #tpu.memory_space<vmem>>) target_semaphore(%101 : memref<!tpu.dma_semaphore, #tpu.memory_space<semaphore_mem>>)
      %c7_i32 = arith.constant 7 : i32
      %102 = arith.addi %31, %c7_i32 : i32
      %c0_i32_71 = arith.constant 0 : i32
      %103 = arith.addi %2, %c0_i32_71 : i32
      %104 = arith.addi %103, %102 : i32
      %105 = arith.index_cast %104 : i32 to index
      %106 = memref.load %arg2[%105] : memref<128xi32, #tpu.memory_space<smem>>
      %c0_i32_72 = arith.constant 0 : i32
      %c0_i32_73 = arith.constant 0 : i32
      %c0_i32_74 = arith.constant 0 : i32
      %107 = tpu.memref_slice %arg4[%106, %c0_i32_74] : memref<2048x512xf32, #tpu.memory_space<any>> -> memref<1x512xf32, #tpu.memory_space<any>>
      %c0_i32_75 = arith.constant 0 : i32
      %108 = tpu.memref_slice %arg6[%c0_i32_72, %102, %c0_i32_75] : memref<2x32x512xf32, #tpu.memory_space<vmem>> -> memref<1x1x512xf32, #tpu.memory_space<vmem>>
      %109 = tpu.memref_squeeze %108 : memref<1x1x512xf32, #tpu.memory_space<vmem>> -> memref<1x512xf32, #tpu.memory_space<vmem>>
      %110 = tpu.memref_slice %arg7[%c0_i32_73] : memref<2x!tpu.dma_semaphore, #tpu.memory_space<semaphore_mem>> -> memref<1x!tpu.dma_semaphore, #tpu.memory_space<semaphore_mem>>
      %111 = tpu.memref_squeeze %110 : memref<1x!tpu.dma_semaphore, #tpu.memory_space<semaphore_mem>> -> memref<!tpu.dma_semaphore, #tpu.memory_space<semaphore_mem>>
      tpu.enqueue_dma source(%107 : memref<1x512xf32, #tpu.memory_space<any>>) target(%109 : memref<1x512xf32, #tpu.memory_space<vmem>>) target_semaphore(%111 : memref<!tpu.dma_semaphore, #tpu.memory_space<semaphore_mem>>)
    }
    %c4_i32_1 = arith.constant 4 : i32
    %c0_i32_2 = arith.constant 0 : i32
    %c4_i32_3 = arith.constant 4 : i32
    %4 = arith.addi %c0_i32_2, %c4_i32_3 : i32
    %c1_i32_4 = arith.constant 1 : i32
    scf.for %arg8 = %c0_i32_2 to %4 step %c1_i32_4  : i32 {
      %c8_i32 = arith.constant 8 : i32
      %31 = arith.muli %arg8, %c8_i32 : i32
      %c0_i32_33 = arith.constant 0 : i32
      %32 = arith.addi %31, %c0_i32_33 : i32
      %c32_i32 = arith.constant 32 : i32
      %33 = arith.addi %2, %c32_i32 : i32
      %34 = arith.addi %33, %32 : i32
      %35 = arith.index_cast %34 : i32 to index
      %36 = memref.load %arg2[%35] : memref<128xi32, #tpu.memory_space<smem>>
      %c1_i32_34 = arith.constant 1 : i32
      %c1_i32_35 = arith.constant 1 : i32
      %c0_i32_36 = arith.constant 0 : i32
      %37 = tpu.memref_slice %arg4[%36, %c0_i32_36] : memref<2048x512xf32, #tpu.memory_space<any>> -> memref<1x512xf32, #tpu.memory_space<any>>
      %c0_i32_37 = arith.constant 0 : i32
      %38 = tpu.memref_slice %arg6[%c1_i32_34, %32, %c0_i32_37] : memref<2x32x512xf32, #tpu.memory_space<vmem>> -> memref<1x1x512xf32, #tpu.memory_space<vmem>>
      %39 = tpu.memref_squeeze %38 : memref<1x1x512xf32, #tpu.memory_space<vmem>> -> memref<1x512xf32, #tpu.memory_space<vmem>>
      %40 = tpu.memref_slice %arg7[%c1_i32_35] : memref<2x!tpu.dma_semaphore, #tpu.memory_space<semaphore_mem>> -> memref<1x!tpu.dma_semaphore, #tpu.memory_space<semaphore_mem>>
      %41 = tpu.memref_squeeze %40 : memref<1x!tpu.dma_semaphore, #tpu.memory_space<semaphore_mem>> -> memref<!tpu.dma_semaphore, #tpu.memory_space<semaphore_mem>>
      tpu.enqueue_dma source(%37 : memref<1x512xf32, #tpu.memory_space<any>>) target(%39 : memref<1x512xf32, #tpu.memory_space<vmem>>) target_semaphore(%41 : memref<!tpu.dma_semaphore, #tpu.memory_space<semaphore_mem>>)
      %c1_i32_38 = arith.constant 1 : i32
      %42 = arith.addi %31, %c1_i32_38 : i32
      %c32_i32_39 = arith.constant 32 : i32
      %43 = arith.addi %2, %c32_i32_39 : i32
      %44 = arith.addi %43, %42 : i32
      %45 = arith.index_cast %44 : i32 to index
      %46 = memref.load %arg2[%45] : memref<128xi32, #tpu.memory_space<smem>>
      %c1_i32_40 = arith.constant 1 : i32
      %c1_i32_41 = arith.constant 1 : i32
      %c0_i32_42 = arith.constant 0 : i32
      %47 = tpu.memref_slice %arg4[%46, %c0_i32_42] : memref<2048x512xf32, #tpu.memory_space<any>> -> memref<1x512xf32, #tpu.memory_space<any>>
      %c0_i32_43 = arith.constant 0 : i32
      %48 = tpu.memref_slice %arg6[%c1_i32_40, %42, %c0_i32_43] : memref<2x32x512xf32, #tpu.memory_space<vmem>> -> memref<1x1x512xf32, #tpu.memory_space<vmem>>
      %49 = tpu.memref_squeeze %48 : memref<1x1x512xf32, #tpu.memory_space<vmem>> -> memref<1x512xf32, #tpu.memory_space<vmem>>
      %50 = tpu.memref_slice %arg7[%c1_i32_41] : memref<2x!tpu.dma_semaphore, #tpu.memory_space<semaphore_mem>> -> memref<1x!tpu.dma_semaphore, #tpu.memory_space<semaphore_mem>>
      %51 = tpu.memref_squeeze %50 : memref<1x!tpu.dma_semaphore, #tpu.memory_space<semaphore_mem>> -> memref<!tpu.dma_semaphore, #tpu.memory_space<semaphore_mem>>
      tpu.enqueue_dma source(%47 : memref<1x512xf32, #tpu.memory_space<any>>) target(%49 : memref<1x512xf32, #tpu.memory_space<vmem>>) target_semaphore(%51 : memref<!tpu.dma_semaphore, #tpu.memory_space<semaphore_mem>>)
      %c2_i32 = arith.constant 2 : i32
      %52 = arith.addi %31, %c2_i32 : i32
      %c32_i32_44 = arith.constant 32 : i32
      %53 = arith.addi %2, %c32_i32_44 : i32
      %54 = arith.addi %53, %52 : i32
      %55 = arith.index_cast %54 : i32 to index
      %56 = memref.load %arg2[%55] : memref<128xi32, #tpu.memory_space<smem>>
      %c1_i32_45 = arith.constant 1 : i32
      %c1_i32_46 = arith.constant 1 : i32
      %c0_i32_47 = arith.constant 0 : i32
      %57 = tpu.memref_slice %arg4[%56, %c0_i32_47] : memref<2048x512xf32, #tpu.memory_space<any>> -> memref<1x512xf32, #tpu.memory_space<any>>
      %c0_i32_48 = arith.constant 0 : i32
      %58 = tpu.memref_slice %arg6[%c1_i32_45, %52, %c0_i32_48] : memref<2x32x512xf32, #tpu.memory_space<vmem>> -> memref<1x1x512xf32, #tpu.memory_space<vmem>>
      %59 = tpu.memref_squeeze %58 : memref<1x1x512xf32, #tpu.memory_space<vmem>> -> memref<1x512xf32, #tpu.memory_space<vmem>>
      %60 = tpu.memref_slice %arg7[%c1_i32_46] : memref<2x!tpu.dma_semaphore, #tpu.memory_space<semaphore_mem>> -> memref<1x!tpu.dma_semaphore, #tpu.memory_space<semaphore_mem>>
      %61 = tpu.memref_squeeze %60 : memref<1x!tpu.dma_semaphore, #tpu.memory_space<semaphore_mem>> -> memref<!tpu.dma_semaphore, #tpu.memory_space<semaphore_mem>>
      tpu.enqueue_dma source(%57 : memref<1x512xf32, #tpu.memory_space<any>>) target(%59 : memref<1x512xf32, #tpu.memory_space<vmem>>) target_semaphore(%61 : memref<!tpu.dma_semaphore, #tpu.memory_space<semaphore_mem>>)
      %c3_i32 = arith.constant 3 : i32
      %62 = arith.addi %31, %c3_i32 : i32
      %c32_i32_49 = arith.constant 32 : i32
      %63 = arith.addi %2, %c32_i32_49 : i32
      %64 = arith.addi %63, %62 : i32
      %65 = arith.index_cast %64 : i32 to index
      %66 = memref.load %arg2[%65] : memref<128xi32, #tpu.memory_space<smem>>
      %c1_i32_50 = arith.constant 1 : i32
      %c1_i32_51 = arith.constant 1 : i32
      %c0_i32_52 = arith.constant 0 : i32
      %67 = tpu.memref_slice %arg4[%66, %c0_i32_52] : memref<2048x512xf32, #tpu.memory_space<any>> -> memref<1x512xf32, #tpu.memory_space<any>>
      %c0_i32_53 = arith.constant 0 : i32
      %68 = tpu.memref_slice %arg6[%c1_i32_50, %62, %c0_i32_53] : memref<2x32x512xf32, #tpu.memory_space<vmem>> -> memref<1x1x512xf32, #tpu.memory_space<vmem>>
      %69 = tpu.memref_squeeze %68 : memref<1x1x512xf32, #tpu.memory_space<vmem>> -> memref<1x512xf32, #tpu.memory_space<vmem>>
      %70 = tpu.memref_slice %arg7[%c1_i32_51] : memref<2x!tpu.dma_semaphore, #tpu.memory_space<semaphore_mem>> -> memref<1x!tpu.dma_semaphore, #tpu.memory_space<semaphore_mem>>
      %71 = tpu.memref_squeeze %70 : memref<1x!tpu.dma_semaphore, #tpu.memory_space<semaphore_mem>> -> memref<!tpu.dma_semaphore, #tpu.memory_space<semaphore_mem>>
      tpu.enqueue_dma source(%67 : memref<1x512xf32, #tpu.memory_space<any>>) target(%69 : memref<1x512xf32, #tpu.memory_space<vmem>>) target_semaphore(%71 : memref<!tpu.dma_semaphore, #tpu.memory_space<semaphore_mem>>)
      %c4_i32_54 = arith.constant 4 : i32
      %72 = arith.addi %31, %c4_i32_54 : i32
      %c32_i32_55 = arith.constant 32 : i32
      %73 = arith.addi %2, %c32_i32_55 : i32
      %74 = arith.addi %73, %72 : i32
      %75 = arith.index_cast %74 : i32 to index
      %76 = memref.load %arg2[%75] : memref<128xi32, #tpu.memory_space<smem>>
      %c1_i32_56 = arith.constant 1 : i32
      %c1_i32_57 = arith.constant 1 : i32
      %c0_i32_58 = arith.constant 0 : i32
      %77 = tpu.memref_slice %arg4[%76, %c0_i32_58] : memref<2048x512xf32, #tpu.memory_space<any>> -> memref<1x512xf32, #tpu.memory_space<any>>
      %c0_i32_59 = arith.constant 0 : i32
      %78 = tpu.memref_slice %arg6[%c1_i32_56, %72, %c0_i32_59] : memref<2x32x512xf32, #tpu.memory_space<vmem>> -> memref<1x1x512xf32, #tpu.memory_space<vmem>>
      %79 = tpu.memref_squeeze %78 : memref<1x1x512xf32, #tpu.memory_space<vmem>> -> memref<1x512xf32, #tpu.memory_space<vmem>>
      %80 = tpu.memref_slice %arg7[%c1_i32_57] : memref<2x!tpu.dma_semaphore, #tpu.memory_space<semaphore_mem>> -> memref<1x!tpu.dma_semaphore, #tpu.memory_space<semaphore_mem>>
      %81 = tpu.memref_squeeze %80 : memref<1x!tpu.dma_semaphore, #tpu.memory_space<semaphore_mem>> -> memref<!tpu.dma_semaphore, #tpu.memory_space<semaphore_mem>>
      tpu.enqueue_dma source(%77 : memref<1x512xf32, #tpu.memory_space<any>>) target(%79 : memref<1x512xf32, #tpu.memory_space<vmem>>) target_semaphore(%81 : memref<!tpu.dma_semaphore, #tpu.memory_space<semaphore_mem>>)
      %c5_i32 = arith.constant 5 : i32
      %82 = arith.addi %31, %c5_i32 : i32
      %c32_i32_60 = arith.constant 32 : i32
      %83 = arith.addi %2, %c32_i32_60 : i32
      %84 = arith.addi %83, %82 : i32
      %85 = arith.index_cast %84 : i32 to index
      %86 = memref.load %arg2[%85] : memref<128xi32, #tpu.memory_space<smem>>
      %c1_i32_61 = arith.constant 1 : i32
      %c1_i32_62 = arith.constant 1 : i32
      %c0_i32_63 = arith.constant 0 : i32
      %87 = tpu.memref_slice %arg4[%86, %c0_i32_63] : memref<2048x512xf32, #tpu.memory_space<any>> -> memref<1x512xf32, #tpu.memory_space<any>>
      %c0_i32_64 = arith.constant 0 : i32
      %88 = tpu.memref_slice %arg6[%c1_i32_61, %82, %c0_i32_64] : memref<2x32x512xf32, #tpu.memory_space<vmem>> -> memref<1x1x512xf32, #tpu.memory_space<vmem>>
      %89 = tpu.memref_squeeze %88 : memref<1x1x512xf32, #tpu.memory_space<vmem>> -> memref<1x512xf32, #tpu.memory_space<vmem>>
      %90 = tpu.memref_slice %arg7[%c1_i32_62] : memref<2x!tpu.dma_semaphore, #tpu.memory_space<semaphore_mem>> -> memref<1x!tpu.dma_semaphore, #tpu.memory_space<semaphore_mem>>
      %91 = tpu.memref_squeeze %90 : memref<1x!tpu.dma_semaphore, #tpu.memory_space<semaphore_mem>> -> memref<!tpu.dma_semaphore, #tpu.memory_space<semaphore_mem>>
      tpu.enqueue_dma source(%87 : memref<1x512xf32, #tpu.memory_space<any>>) target(%89 : memref<1x512xf32, #tpu.memory_space<vmem>>) target_semaphore(%91 : memref<!tpu.dma_semaphore, #tpu.memory_space<semaphore_mem>>)
      %c6_i32 = arith.constant 6 : i32
      %92 = arith.addi %31, %c6_i32 : i32
      %c32_i32_65 = arith.constant 32 : i32
      %93 = arith.addi %2, %c32_i32_65 : i32
      %94 = arith.addi %93, %92 : i32
      %95 = arith.index_cast %94 : i32 to index
      %96 = memref.load %arg2[%95] : memref<128xi32, #tpu.memory_space<smem>>
      %c1_i32_66 = arith.constant 1 : i32
      %c1_i32_67 = arith.constant 1 : i32
      %c0_i32_68 = arith.constant 0 : i32
      %97 = tpu.memref_slice %arg4[%96, %c0_i32_68] : memref<2048x512xf32, #tpu.memory_space<any>> -> memref<1x512xf32, #tpu.memory_space<any>>
      %c0_i32_69 = arith.constant 0 : i32
      %98 = tpu.memref_slice %arg6[%c1_i32_66, %92, %c0_i32_69] : memref<2x32x512xf32, #tpu.memory_space<vmem>> -> memref<1x1x512xf32, #tpu.memory_space<vmem>>
      %99 = tpu.memref_squeeze %98 : memref<1x1x512xf32, #tpu.memory_space<vmem>> -> memref<1x512xf32, #tpu.memory_space<vmem>>
      %100 = tpu.memref_slice %arg7[%c1_i32_67] : memref<2x!tpu.dma_semaphore, #tpu.memory_space<semaphore_mem>> -> memref<1x!tpu.dma_semaphore, #tpu.memory_space<semaphore_mem>>
      %101 = tpu.memref_squeeze %100 : memref<1x!tpu.dma_semaphore, #tpu.memory_space<semaphore_mem>> -> memref<!tpu.dma_semaphore, #tpu.memory_space<semaphore_mem>>
      tpu.enqueue_dma source(%97 : memref<1x512xf32, #tpu.memory_space<any>>) target(%99 : memref<1x512xf32, #tpu.memory_space<vmem>>) target_semaphore(%101 : memref<!tpu.dma_semaphore, #tpu.memory_space<semaphore_mem>>)
      %c7_i32 = arith.constant 7 : i32
      %102 = arith.addi %31, %c7_i32 : i32
      %c32_i32_70 = arith.constant 32 : i32
      %103 = arith.addi %2, %c32_i32_70 : i32
      %104 = arith.addi %103, %102 : i32
      %105 = arith.index_cast %104 : i32 to index
      %106 = memref.load %arg2[%105] : memref<128xi32, #tpu.memory_space<smem>>
      %c1_i32_71 = arith.constant 1 : i32
      %c1_i32_72 = arith.constant 1 : i32
      %c0_i32_73 = arith.constant 0 : i32
      %107 = tpu.memref_slice %arg4[%106, %c0_i32_73] : memref<2048x512xf32, #tpu.memory_space<any>> -> memref<1x512xf32, #tpu.memory_space<any>>
      %c0_i32_74 = arith.constant 0 : i32
      %108 = tpu.memref_slice %arg6[%c1_i32_71, %102, %c0_i32_74] : memref<2x32x512xf32, #tpu.memory_space<vmem>> -> memref<1x1x512xf32, #tpu.memory_space<vmem>>
      %109 = tpu.memref_squeeze %108 : memref<1x1x512xf32, #tpu.memory_space<vmem>> -> memref<1x512xf32, #tpu.memory_space<vmem>>
      %110 = tpu.memref_slice %arg7[%c1_i32_72] : memref<2x!tpu.dma_semaphore, #tpu.memory_space<semaphore_mem>> -> memref<1x!tpu.dma_semaphore, #tpu.memory_space<semaphore_mem>>
      %111 = tpu.memref_squeeze %110 : memref<1x!tpu.dma_semaphore, #tpu.memory_space<semaphore_mem>> -> memref<!tpu.dma_semaphore, #tpu.memory_space<semaphore_mem>>
      tpu.enqueue_dma source(%107 : memref<1x512xf32, #tpu.memory_space<any>>) target(%109 : memref<1x512xf32, #tpu.memory_space<vmem>>) target_semaphore(%111 : memref<!tpu.dma_semaphore, #tpu.memory_space<semaphore_mem>>)
    }
    %c4_i32_5 = arith.constant 4 : i32
    %c0_i32_6 = arith.constant 0 : i32
    %c0_i32_7 = arith.constant 0 : i32
    %c0_i32_8 = arith.constant 0 : i32
    %c0_i32_9 = arith.constant 0 : i32
    %c0_i32_10 = arith.constant 0 : i32
    %5 = tpu.memref_slice %arg6[%c0_i32_6, %c0_i32_9, %c0_i32_10] : memref<2x32x512xf32, #tpu.memory_space<vmem>> -> memref<1x32x512xf32, #tpu.memory_space<vmem>>
    %6 = tpu.memref_squeeze %5 : memref<1x32x512xf32, #tpu.memory_space<vmem>> -> memref<32x512xf32, #tpu.memory_space<vmem>>
    %c0_i32_11 = arith.constant 0 : i32
    %c0_i32_12 = arith.constant 0 : i32
    %7 = tpu.memref_slice %arg6[%c0_i32_7, %c0_i32_11, %c0_i32_12] : memref<2x32x512xf32, #tpu.memory_space<vmem>> -> memref<1x32x512xf32, #tpu.memory_space<vmem>>
    %8 = tpu.memref_squeeze %7 : memref<1x32x512xf32, #tpu.memory_space<vmem>> -> memref<32x512xf32, #tpu.memory_space<vmem>>
    %9 = tpu.memref_slice %arg7[%c0_i32_8] : memref<2x!tpu.dma_semaphore, #tpu.memory_space<semaphore_mem>> -> memref<1x!tpu.dma_semaphore, #tpu.memory_space<semaphore_mem>>
    %10 = tpu.memref_squeeze %9 : memref<1x!tpu.dma_semaphore, #tpu.memory_space<semaphore_mem>> -> memref<!tpu.dma_semaphore, #tpu.memory_space<semaphore_mem>>
    tpu.wait_dma2 semaphore(%10 : memref<!tpu.dma_semaphore, #tpu.memory_space<semaphore_mem>>) src(%6 : memref<32x512xf32, #tpu.memory_space<vmem>>) dst(%8 : memref<32x512xf32, #tpu.memory_space<vmem>>)
    %c0 = arith.constant 0 : index
    %c0_13 = arith.constant 0 : index
    %c0_14 = arith.constant 0 : index
    %11 = vector.load %arg6[%c0, %c0_13, %c0_14] : memref<2x32x512xf32, #tpu.memory_space<vmem>>, vector<1x32x512xf32>
    %12 = vector.shape_cast %11 : vector<1x32x512xf32> to vector<32x512xf32>
    %c0_15 = arith.constant 0 : index
    %c0_16 = arith.constant 0 : index
    %13 = vector.load %arg3[%c0_15, %c0_16] : memref<64x512xf32, #tpu.memory_space<vmem>>, vector<32x512xf32>
    %14 = arith.addf %12, %13 : vector<32x512xf32>
    %c0_17 = arith.constant 0 : index
    %c0_18 = arith.constant 0 : index
    %c0_19 = arith.constant 0 : index
    %15 = vector.load %arg5[%c0_17, %c0_18, %c0_19] : memref<1x64x512xf32, #tpu.memory_space<vmem>>, vector<1x32x512xf32>
    %16 = vector.shape_cast %15 : vector<1x32x512xf32> to vector<32x512xf32>
    %17 = vector.shape_cast %14 : vector<32x512xf32> to vector<1x32x512xf32>
    tpu.vector_store %arg5[%c0_17, %c0_18, %c0_19], %17 {strides = array<i32>} : memref<1x64x512xf32, #tpu.memory_space<vmem>>, vector<1x32x512xf32>,
    %c1_i32_20 = arith.constant 1 : i32
    %c1_i32_21 = arith.constant 1 : i32
    %c1_i32_22 = arith.constant 1 : i32
    %c0_i32_23 = arith.constant 0 : i32
    %c0_i32_24 = arith.constant 0 : i32
    %18 = tpu.memref_slice %arg6[%c1_i32_20, %c0_i32_23, %c0_i32_24] : memref<2x32x512xf32, #tpu.memory_space<vmem>> -> memref<1x32x512xf32, #tpu.memory_space<vmem>>
    %19 = tpu.memref_squeeze %18 : memref<1x32x512xf32, #tpu.memory_space<vmem>> -> memref<32x512xf32, #tpu.memory_space<vmem>>
    %c0_i32_25 = arith.constant 0 : i32
    %c0_i32_26 = arith.constant 0 : i32
    %20 = tpu.memref_slice %arg6[%c1_i32_21, %c0_i32_25, %c0_i32_26] : memref<2x32x512xf32, #tpu.memory_space<vmem>> -> memref<1x32x512xf32, #tpu.memory_space<vmem>>
    %21 = tpu.memref_squeeze %20 : memref<1x32x512xf32, #tpu.memory_space<vmem>> -> memref<32x512xf32, #tpu.memory_space<vmem>>
    %22 = tpu.memref_slice %arg7[%c1_i32_22] : memref<2x!tpu.dma_semaphore, #tpu.memory_space<semaphore_mem>> -> memref<1x!tpu.dma_semaphore, #tpu.memory_space<semaphore_mem>>
    %23 = tpu.memref_squeeze %22 : memref<1x!tpu.dma_semaphore, #tpu.memory_space<semaphore_mem>> -> memref<!tpu.dma_semaphore, #tpu.memory_space<semaphore_mem>>
    tpu.wait_dma2 semaphore(%23 : memref<!tpu.dma_semaphore, #tpu.memory_space<semaphore_mem>>) src(%19 : memref<32x512xf32, #tpu.memory_space<vmem>>) dst(%21 : memref<32x512xf32, #tpu.memory_space<vmem>>)
    %c1 = arith.constant 1 : index
    %c0_27 = arith.constant 0 : index
    %c0_28 = arith.constant 0 : index
    %24 = vector.load %arg6[%c1, %c0_27, %c0_28] : memref<2x32x512xf32, #tpu.memory_space<vmem>>, vector<1x32x512xf32>
    %25 = vector.shape_cast %24 : vector<1x32x512xf32> to vector<32x512xf32>
    %c32 = arith.constant 32 : index
    %c0_29 = arith.constant 0 : index
    %26 = vector.load %arg3[%c32, %c0_29] : memref<64x512xf32, #tpu.memory_space<vmem>>, vector<32x512xf32>
    %27 = arith.addf %25, %26 : vector<32x512xf32>
    %c0_30 = arith.constant 0 : index
    %c32_31 = arith.constant 32 : index
    %c0_32 = arith.constant 0 : index
    %28 = vector.load %arg5[%c0_30, %c32_31, %c0_32] : memref<1x64x512xf32, #tpu.memory_space<vmem>>, vector<1x32x512xf32>
    %29 = vector.shape_cast %28 : vector<1x32x512xf32> to vector<32x512xf32>
    %30 = vector.shape_cast %27 : vector<32x512xf32> to vector<1x32x512xf32>
    tpu.vector_store %arg5[%c0_30, %c32_31, %c0_32], %30 {strides = array<i32>} : memref<1x64x512xf32, #tpu.memory_space<vmem>>, vector<1x32x512xf32>,
    return
  }
  func.func @transform_0(%arg0: i32, %arg1: i32, %arg2: memref<128xi32, #tpu.memory_space<smem>>) -> (i32, i32) {
    %c0_i32 = arith.constant 0 : i32
    %c0_i32_0 = arith.constant 0 : i32
    return %arg1, %c0_i32 : i32, i32
  }
  func.func @transform_2(%arg0: i32, %arg1: i32, %arg2: memref<128xi32, #tpu.memory_space<smem>>) -> (i32, i32, i32) {
    %c0_i32 = arith.constant 0 : i32
    %c0_i32_0 = arith.constant 0 : i32
    return %arg0, %arg1, %c0_i32 : i32, i32, i32
  }
}

</mosaic_0001>

<bundles_post_ra>
// kernel: tpu_custom_call.1
= control target key start
LH: loop header
LB: loop body
LE: loop exit
PB: predicated region body
PF: predicated region fallthrough
CT: control target
= control target key end

     0   :  { %s2112_s0 = inlined_call_operand.hbm [shape: s32[128], index: 0, kind: input, shape index: {}]   ;;  %s2113_s1 = inlined_call_operand.hbm [shape: f32[64,512], index: 1, kind: input, shape index: {}]   ;;  %s2114_s2 = inlined_call_operand.hbm [shape: f32[2048,512], index: 2, kind: input, shape index: {}]   ;;  %s2115_s3 = inlined_call_operand.hbm [shape: f32[2,64,512], index: 3, kind: output, shape index: {}]  }
   0x1   :  { %2138 = sst [smem:[#allocation42_spill]] %s2113_s1  ;;  %s998_s14 = scalar_lea.hbm %s2112_s0, 16 }
   0x2   :  { %2139 = sst [smem:[#allocation43_spill]] %s2115_s3  ;;  %p999_p0 = scmp.ne.s32.totalorder %s2112_s0, %s998_s14 }
   0x3   :  { %p1002_p1 = scmp.lt.u32.totalorder %s998_s14, %s2112_s0 }
   0x5   :  { %p1004_p2 = pnand %p1002_p1, %p999_p0 }
   0x7   :  { %1007 = shalt.err (!%p1004_p2)  }
   0x8   :  { %s1526_s19 = smov [#allocation5]  }
   0x9   :  { %9 = dma.hbm_to_smem %s2112_s0, 16, %s1526_s19, [#allocation4] }
   0xa   :  { %1480 = dma.done.wait [#allocation4], 16 }
   0xb   :  { %1481 = vsyncadd [#allocation4], 4294967280 }
   0xc   :  { %11 = sfence }
   0xd   :  { %12 = vsyncpa [#allocation7], 0 }
   0xe   :  { %13 = vsyncpa [#allocation8], 0 }
   0xf   :  { %15 = vsyncpa [#allocation8 + $0x1], 0  ;;  %s1570_s22 = smov 0   ;;  %s1572_s23 = smov 0  }
  0x10   :  { %s1574_s24 = smov 0   ;;  %s1576_s25 = smov 0  }
  0x11   :  { %s1578_s26 = smov 0   ;;  %s1580_s27 = smov 0  }
  0x12 LB: > { %2140 = sst [smem:[#allocation31_spill]] %s1496_s22  ;;  %s841_s0 = sadd.s32 4294967295, %s1516_s27   ;;  %s1516_s27 = sphi %s1580_s27, %s21_s27   ;;  %s1512_s26 = sphi %s1578_s26, %s2176_s26   ;;  %s1508_s25 = sphi %s1576_s25, %s2175_s25   ;;  %s1504_s24 = sphi %s1574_s24, %s2174_s24   ;;  %s1500_s23 = sphi %s1572_s23, %s2173_s23   ;;  %s1496_s22 = sphi %s1570_s22, %s2172_s22  }
  0x13   : > { %2141 = sst [smem:[#allocation32_spill]] %s1500_s23  ;;  %s842_s28 = sadd.s32 4294967294, %s1516_s27  }
  0x14   : > { %2142 = sst [smem:[#allocation33_spill]] %s1504_s24  ;;  %s33_s29 = sadd.s32 1, %s1512_s26 }
  0x15   : > { %2143 = sst [smem:[#allocation34_spill]] %s1508_s25  ;;  %s68_s30 = sadd.s32 1, %s1504_s24 }
  0x16   : > { %2144 = sst [smem:[#allocation35_spill]] %s1512_s26  ;;  %p35_p3 = scmp.ge.s32.totalorder %s33_s29, 2 }
  0x17   : > { %2145 = sst [smem:[#allocation36_spill]] %s1516_s27  ;;  %p78_p4 = scmp.ne.s32.totalorder %s1504_s24, %s1500_s23 }
  0x18   : > { %p79_p5 = scmp.eq.s32.totalorder %s841_s0, 1  ;;  %p84_p6 = scmp.ne.s32.totalorder %s1500_s23, %s1496_s22 }
  0x19   : > { %s2178_s29 = smov (%p35_p3, %s33_s29), 0  ;;  %p85_p8 = scmp.eq.s32.totalorder %s842_s28, 1 }
  0x1a   : > { %2146 = sst [smem:[#allocation37_spill]] %s2178_s29  ;;  %p1610_p7 = por %p79_p5, %p78_p4 }
  0x1b   : > { %s63_s5 = ssub.s32 %s1512_s26, %s2178_s29  ;;  %p843_p9 = scmp.ge.s32.totalorder %s1516_s27, 1 }
  0x1c   : > { %s2147_s4 = scalar_select %p1610_p7, 1, 0 }
  0x1d   : > { %p66_p10 = scmp.eq.s32.totalorder %s63_s5, 0  ;;  %p1617_p11 = por %p85_p8, %p84_p6 }
  0x1e   : > { %2148 = sst [smem:[#allocation38_spill]] %s2147_s4  ;;  %p92_p12 = scmp.lt.s32.totalorder %s1516_s27, 3 }
  0x1f   : > { %s2149_s6 = scalar_select %p1617_p11, 1, 0 }
  0x20   : > { %s1623_s7 = scalar_select %p66_p10, %s1504_s24, %s68_s30  }
  0x21   : > { %2150 = sst [smem:[#allocation39_spill]] %s2149_s6  ;;  %p1625_p13 = pnand %p843_p9, %p92_p12 }
  0x22   : > { %2151 = sst [smem:[#allocation40_spill]] %s1623_s7  ;;  %p1629_p0 = scmp.eq.s32.totalorder %s841_s0, 0 }
  0x23   : > { %s2152_s8 = scalar_select %p1625_p13, 1, 0 }
  0x24   : > { %s2153_s9 = scalar_select %p1629_p0, 1, 0 }
  0x25   : > { %p913_p1 = pneg %p1625_p13  ;;  %s1527_s10 = smov [#allocation6]  }
  0x26   : > { %s108_s11 = sshll.u32 %s1527_s10, 4  ;;  %s2155_s1 = sld [smem:[#allocation42_spill]]  ;;  %s109_s11 = int_to_ptr.vmem [resolvable:$true] %s108_s11 }
  0x27   : > { %p1637_p2 = pnand %p1629_p0, %p913_p1 }
  0x29   : > { %p1010_p4 = pneg %p1637_p2 }
  0x2c   : > { %s1008_s15 = scalar_lea.hbm %s2155_s1, 4096 }
  0x2d   : > { %p1009_p3 = scmp.ne.s32.totalorder %s2155_s1, %s1008_s15  ;;  %p1015_p8 = scmp.lt.u32.totalorder %s1008_s15, %s2155_s1 }
  0x2f   : > { %p1011_p5 = pnand %p1010_p4, %p1009_p3 }
  0x31   : > { %p1012_p6 = pneg %p1011_p5 }
  0x33   : > { %p1017_p9 = pnand %p1015_p8, %p1012_p6 }
  0x35   : > { %1020 = shalt.err (!%p1017_p9)
}
  0x36   : > { %s1021_s20 = scalar_lea.vmem %s109_s11, 4096  ;;  %p1029_p11 = scmp.lt.s32.totalorder %s109_s11, %s109_s11 }
  0x37   : > { %p1022_p10 = scmp.ne.s32.totalorder %s109_s11, %s1021_s20  ;;  %p1030_p7 = scmp.lt.s32.totalorder %s1021_s20, %s1021_s20 }
  0x39   : > { %p1024_p12 = pnand %p1022_p10, %p1010_p4  ;;  %p1031_p0 = por %p1030_p7, %p1029_p11 }
  0x3b   : > { %p1025_p1 = pneg %p1024_p12 }
  0x3d   : > { %p1032_p13 = pnand %p1031_p0, %p1025_p1 }
  0x3f   : > { %1035 = shalt.err (!%p1032_p13)
}
  0x40   : > { %s1528_s21 = smov 512   ;;  %s1529_s0 = smov 32  }
  0x41   : > { %916 = dma.hbm_to_vmem [thread:$0]  (!%p1637_p2), %s2155_s1, 4096, %s109_s11, [#allocation7], %s1528_s21, %s1528_s21, %s1529_s0  }
  0x42   : > { %p2156_p3 = scmp.ne.s32.totalorder %s2152_s8, 0 }
  0x44   : > { %124 = sbr.rel (%p2156_p3) target bundleno = 597 (0x255), region = 24 }
  0x4b   : > { %p2157_p5 = scmp.ne.s32.totalorder %s2153_s9, 0 }
  0x4d   : > { %1483 = dma.done.wait (%p2157_p5), [#allocation7], 4096  }
  0x4e   : > { %1485 = vsyncadd (%p2157_p5), [#allocation7], 4294963200  ;;  %s2120_s5 = sand.u32 1, %s1500_s23   ;;  %s1665_s10 = sshll.u32 %s1508_s25, 6 }
  0x4f   : > { %2158 = sst [smem:[#allocation41_spill]] %s1665_s10  ;;  %s847_s12 = sshll.u32 %s2120_s5, 8 }
  0x50   : > { %s1669_s13 = scalar_lea.vmem [#allocation9], %s847_s12  ;;  %s1671_s11 = smov 0  }
  0x51 LB: >> { %s1677_s8 = sshll.u32 %s1520_s11, 3  ;;  %s1520_s11 = sphi %s1671_s11, %s149_s11  }
  0x52   : >> { %s151_s9 = sadd.s32 %s1677_s8, %s1665_s10  ;;  %s159_s14 = sshrl.u32 %s1677_s8, 3 }
  0x53   : >> { %s152_s15 = sld [smem:[#allocation5 + %s151_s9]]  ;;  %s160_s16 = sand.u32 7, %s1677_s8  }
  0x54   : >> { %s852_s17 = sshll.u32 %s159_s14, 5  ;;  %s169_s18 = sadd.s32 1, %s1677_s8 }
  0x55   : >> { %s162_s19 = sadd.s32 %s852_s17, %s160_s16  ;;  %s170_s20 = sadd.s32 %s1665_s10, %s169_s18 }
  0x56   : >> { %s1685_s21 = sld [smem:[#allocation5 + %s170_s20]]  ;;  %s163_s0 = scalar_lea.vmem [#allocation2], %s162_s19 }
  0x57   : >> { %s165_s28 = sshll.u32 %s163_s0, 4  ;;  %s178_s30 = sshrl.u32 %s169_s18, 3  ;;  %s1687_s28 = int_to_ptr.vmem [resolvable:$true] %s165_s28 }
  0x58   : >> { %s179_s12 = sand.u32 7, %s169_s18   ;;  %s855_s26 = sshll.u32 %s178_s30, 5 }
  0x59   : >> { %s153_s5 = sshrl.u32 %s152_s15, 3  ;;  %s154_s1 = sand.u32 7, %s152_s15  }
  0x5a   : >> { %s850_s29 = sshll.u32 %s153_s5, 5  ;;  %s1689_s7 = sadd.s32 %s855_s26, %s179_s12 }
  0x5b   : >> { %s156_s9 = sadd.s32 %s850_s29, %s154_s1  ;;  %s1699_s18 = scalar_lea.hbm %s2114_s2, 131072 }
  0x5c   : >> { %s851_s14 = sshll.u32 %s156_s9, 4  ;;  %s172_s16 = sshrl.u32 %s1685_s21, 3 }
  0x5d   : >> { %s158_s24 = scalar_lea.hbm %s2114_s2, %s851_s14  ;;  %s173_s6 = sand.u32 7, %s1685_s21  }
  0x5e   : >> { %s1036_s19 = scalar_lea.hbm %s158_s24, 64  ;;  %p1039_p11 = scmp.lt.u32.totalorder %s158_s24, %s2114_s2 }
  0x5f   : >> { %p1037_p7 = scmp.ne.s32.totalorder %s158_s24, %s1036_s19  ;;  %p1040_p13 = scmp.lt.u32.totalorder %s1699_s18, %s1036_s19 }
  0x60   : >> { %p1042_p2 = scmp.lt.u32.totalorder %s1036_s19, %s158_s24 }
  0x61   : >> { %p1041_p0 = por %p1040_p13, %p1039_p11 }
  0x63   : >> { %p1043_p4 = por %p1042_p2, %p1041_p0 }
  0x65   : >> { %p1044_p6 = pnand %p1043_p4, %p1037_p7 }
  0x67   : >> { %1047 = shalt.err (!%p1044_p6)  }
  0x68   : >> { %s1048_s1 = scalar_lea.vmem %s1687_s28, 64  ;;  %s1530_s26 = smov [#allocation2]  }
  0x69   : >> { %p1049_p8 = scmp.ne.s32.totalorder %s1687_s28, %s1048_s1  ;;  %s1050_s22 = sshll.u32 %s1530_s26, 4  ;;  %s1707_s22 = int_to_ptr.vmem [resolvable:$false] %s1050_s22 }
  0x6a   : >> { %s1710_s29 = scalar_lea.vmem %s1707_s22, 4096  ;;  %p1053_p9 = scmp.lt.s32.totalorder %s1687_s28, %s1707_s22 }
  0x6b   : >> { %p1054_p10 = scmp.lt.s32.totalorder %s1710_s29, %s1048_s1 }
  0x6d   : >> { %p1055_p12 = por %p1054_p10, %p1053_p9 }
  0x6f   : >> { %p1056_p1 = pnand %p1055_p12, %p1049_p8 }
  0x71   : >> { %1059 = shalt.err (!%p1056_p1)  }
  0x72   : >> { %s2129_s30 = smov 128   ;;  %s2131_s12 = smov 1  }
  0x73   : >> { %168 = dma.hbm_to_vmem [thread:$0]  %s158_s24, 64, %s1687_s28, [#allocation3], %s2129_s30, %s2129_s30, %s2131_s12 }
  0x74   : >> { %s853_s9 = sshll.u32 %s172_s16, 5  ;;  %s182_s17 = scalar_lea.vmem [#allocation2], %s1689_s7 }
  0x75   : >> { %s175_s14 = sadd.s32 %s853_s9, %s173_s6  ;;  %s184_s20 = sshll.u32 %s182_s17, 4  ;;  %s185_s20 = int_to_ptr.vmem [resolvable:$true] %s184_s20 }
  0x76   : >> { %s854_s19 = sshll.u32 %s175_s14, 4  ;;  %s188_s1 = sadd.s32 2, %s1677_s8 }
  0x77   : >> { %s177_s5 = scalar_lea.hbm %s2114_s2, %s854_s19 }
  0x78   : >> { %s1060_s26 = scalar_lea.hbm %s177_s5, 64  ;;  %p1063_p5 = scmp.lt.u32.totalorder %s177_s5, %s2114_s2 }
  0x79   : >> { %p1061_p3 = scmp.ne.s32.totalorder %s177_s5, %s1060_s26  ;;  %p1064_p7 = scmp.lt.u32.totalorder %s1699_s18, %s1060_s26 }
  0x7a   : >> { %p1066_p13 = scmp.lt.u32.totalorder %s1060_s26, %s177_s5 }
  0x7b   : >> { %p1065_p11 = por %p1064_p7, %p1063_p5 }
  0x7d   : >> { %p1067_p0 = por %p1066_p13, %p1065_p11 }
  0x7f   : >> { %p1068_p2 = pnand %p1067_p0, %p1061_p3 }
  0x81   : >> { %1071 = shalt.err (!%p1068_p2)  }
  0x82   : >> { %s1072_s24 = scalar_lea.vmem %s185_s20, 64  ;;  %p1077_p6 = scmp.lt.s32.totalorder %s185_s20, %s1707_s22 }
  0x83   : >> { %p1073_p4 = scmp.ne.s32.totalorder %s185_s20, %s1072_s24  ;;  %p1078_p8 = scmp.lt.s32.totalorder %s1710_s29, %s1072_s24 }
  0x85   : >> { %p1079_p9 = por %p1078_p8, %p1077_p6 }
  0x87   : >> { %p1080_p10 = pnand %p1079_p9, %p1073_p4 }
  0x89   : >> { %1083 = shalt.err (!%p1080_p10)  }
  0x8a   : >> { %187 = dma.hbm_to_vmem [thread:$0]  %s177_s5, 64, %s185_s20, [#allocation3], %s2129_s30, %s2129_s30, %s2131_s12 }
  0x8b   : >> { %s189_s3 = sadd.s32 %s1665_s10, %s188_s1  ;;  %s197_s27 = sshrl.u32 %s188_s1, 3 }
  0x8c   : >> { %s190_s6 = sld [smem:[#allocation5 + %s189_s3]]  ;;  %s198_s7 = sand.u32 7, %s188_s1  }
  0x8d   : >> { %s858_s21 = sshll.u32 %s197_s27, 5  ;;  %s207_s28 = sadd.s32 3, %s1677_s8 }
  0x8e   : >> { %s200_s16 = sadd.s32 %s858_s21, %s198_s7  ;;  %s208_s9 = sadd.s32 %s1665_s10, %s207_s28 }
  0x8f   : >> { %s1738_s14 = sld [smem:[#allocation5 + %s208_s9]]  ;;  %s201_s17 = scalar_lea.vmem [#allocation2], %s200_s16 }
  0x90   : >> { %s203_s19 = sshll.u32 %s201_s17, 4  ;;  %s216_s0 = sshrl.u32 %s207_s28, 3  ;;  %s1740_s19 = int_to_ptr.vmem [resolvable:$true] %s203_s19 }
  0x91   : >> { %s217_s15 = sand.u32 7, %s207_s28   ;;  %s861_s24 = sshll.u32 %s216_s0, 5 }
  0x92   : >> { %s191_s20 = sshrl.u32 %s190_s6, 3  ;;  %s192_s5 = sand.u32 7, %s190_s6  }
  0x93   : >> { %s856_s26 = sshll.u32 %s191_s20, 5  ;;  %s219_s3 = sadd.s32 %s861_s24, %s217_s15 }
  0x94   : >> { %s194_s1 = sadd.s32 %s856_s26, %s192_s5 }
  0x95   : >> { %s857_s27 = sshll.u32 %s194_s1, 4  ;;  %s210_s7 = sshrl.u32 %s1738_s14, 3 }
  0x96   : >> { %s196_s30 = scalar_lea.hbm %s2114_s2, %s857_s27  ;;  %s211_s12 = sand.u32 7, %s1738_s14  }
  0x97   : >> { %s1084_s16 = scalar_lea.hbm %s196_s30, 64  ;;  %p1087_p1 = scmp.lt.u32.totalorder %s196_s30, %s2114_s2 }
  0x98   : >> { %p1085_p12 = scmp.ne.s32.totalorder %s196_s30, %s1084_s16  ;;  %p1088_p3 = scmp.lt.u32.totalorder %s1699_s18, %s1084_s16 }
  0x99   : >> { %p1090_p7 = scmp.lt.u32.totalorder %s1084_s16, %s196_s30 }
  0x9a   : >> { %p1089_p5 = por %p1088_p3, %p1087_p1 }
  0x9c   : >> { %p1091_p11 = por %p1090_p7, %p1089_p5 }
  0x9e   : >> { %p1092_p13 = pnand %p1091_p11, %p1085_p12 }
  0xa0   : >> { %1095 = shalt.err (!%p1092_p13)  }
  0xa1   : >> { %s1096_s6 = scalar_lea.vmem %s1740_s19, 64  ;;  %p1101_p2 = scmp.lt.s32.totalorder %s1740_s19, %s1707_s22 }
  0xa2   : >> { %p1097_p0 = scmp.ne.s32.totalorder %s1740_s19, %s1096_s6  ;;  %p1102_p4 = scmp.lt.s32.totalorder %s1710_s29, %s1096_s6 }
  0xa4   : >> { %p1103_p6 = por %p1102_p4, %p1101_p2 }
  0xa6   : >> { %p1104_p8 = pnand %p1103_p6, %p1097_p0 }
  0xa8   : >> { %1107 = shalt.err (!%p1104_p8)  }
  0xa9   : >> { %s2159_s4 = smov 1   ;;  %s2160_s28 = smov 128  }
  0xaa   : >> { %206 = dma.hbm_to_vmem [thread:$0]  %s196_s30, 64, %s1740_s19, [#allocation3], %s2160_s28, %s2160_s28, %s2159_s4 }
  0xab   : >> { %s859_s14 = sshll.u32 %s210_s7, 5  ;;  %s220_s15 = scalar_lea.vmem [#allocation2], %s219_s3 }
  0xac   : >> { %s213_s0 = sadd.s32 %s859_s14, %s211_s12  ;;  %s222_s20 = sshll.u32 %s220_s15, 4  ;;  %s223_s20 = int_to_ptr.vmem [resolvable:$true] %s222_s20 }
  0xad   : >> { %s860_s5 = sshll.u32 %s213_s0, 4  ;;  %s226_s27 = sadd.s32 4, %s1677_s8 }
  0xae   : >> { %s215_s1 = scalar_lea.hbm %s2114_s2, %s860_s5 }
  0xaf   : >> { %s1108_s21 = scalar_lea.hbm %s215_s1, 64  ;;  %p1111_p10 = scmp.lt.u32.totalorder %s215_s1, %s2114_s2 }
  0xb0   : >> { %p1109_p9 = scmp.ne.s32.totalorder %s215_s1, %s1108_s21  ;;  %p1112_p12 = scmp.lt.u32.totalorder %s1699_s18, %s1108_s21 }
  0xb1   : >> { %p1114_p3 = scmp.lt.u32.totalorder %s1108_s21, %s215_s1 }
  0xb2   : >> { %p1113_p1 = por %p1112_p12, %p1111_p10 }
  0xb4   : >> { %p1115_p5 = por %p1114_p3, %p1113_p1 }
  0xb6   : >> { %p1116_p7 = pnand %p1115_p5, %p1109_p9 }
  0xb8   : >> { %1119 = shalt.err (!%p1116_p7)  }
  0xb9   : >> { %s1120_s30 = scalar_lea.vmem %s223_s20, 64  ;;  %p1125_p13 = scmp.lt.s32.totalorder %s223_s20, %s1707_s22 }
  0xba   : >> { %p1121_p11 = scmp.ne.s32.totalorder %s223_s20, %s1120_s30  ;;  %p1126_p0 = scmp.lt.s32.totalorder %s1710_s29, %s1120_s30 }
  0xbc   : >> { %p1127_p2 = por %p1126_p0, %p1125_p13 }
  0xbe   : >> { %p1128_p4 = pnand %p1127_p2, %p1121_p11 }
  0xc0   : >> { %1131 = shalt.err (!%p1128_p4)  }
  0xc1   : >> { %225 = dma.hbm_to_vmem [thread:$0]  %s215_s1, 64, %s223_s20, [#allocation3], %s2160_s28, %s2160_s28, %s2159_s4 }
  0xc2   : >> { %s227_s12 = sadd.s32 %s1665_s10, %s226_s27  ;;  %s235_s19 = sshrl.u32 %s226_s27, 3 }
  0xc3   : >> { %s228_s3 = sld [smem:[#allocation5 + %s227_s12]]  ;;  %s236_s7 = sand.u32 7, %s226_s27  }
  0xc4   : >> { %s864_s17 = sshll.u32 %s235_s19, 5  ;;  %s245_s6 = sadd.s32 5, %s1677_s8 }
  0xc5   : >> { %s238_s14 = sadd.s32 %s864_s17, %s236_s7  ;;  %s246_s0 = sadd.s32 %s1665_s10, %s245_s6 }
  0xc6   : >> { %s1776_s15 = sld [smem:[#allocation5 + %s246_s0]]  ;;  %s239_s5 = scalar_lea.vmem [#allocation2], %s238_s14 }
  0xc7   : >> { %s241_s26 = sshll.u32 %s239_s5, 4  ;;  %s254_s24 = sshrl.u32 %s245_s6, 3  ;;  %s1778_s26 = int_to_ptr.vmem [resolvable:$true] %s241_s26 }
  0xc8   : >> { %s255_s21 = sand.u32 7, %s245_s6   ;;  %s867_s16 = sshll.u32 %s254_s24, 5 }
  0xc9   : >> { %s229_s20 = sshrl.u32 %s228_s3, 3  ;;  %s230_s1 = sand.u32 7, %s228_s3  }
  0xca   : >> { %s862_s9 = sshll.u32 %s229_s20, 5  ;;  %s257_s30 = sadd.s32 %s867_s16, %s255_s21 }
  0xcb   : >> { %s232_s27 = sadd.s32 %s862_s9, %s230_s1 }
  0xcc   : >> { %s863_s12 = sshll.u32 %s232_s27, 4  ;;  %s248_s19 = sshrl.u32 %s1776_s15, 3 }
  0xcd   : >> { %s234_s0 = scalar_lea.hbm %s2114_s2, %s863_s12  ;;  %s249_s23 = sand.u32 7, %s1776_s15  }
  0xce   : >> { %s1132_s14 = scalar_lea.hbm %s234_s0, 64  ;;  %p1135_p8 = scmp.lt.u32.totalorder %s234_s0, %s2114_s2 }
  0xcf   : >> { %p1133_p6 = scmp.ne.s32.totalorder %s234_s0, %s1132_s14  ;;  %p1136_p9 = scmp.lt.u32.totalorder %s1699_s18, %s1132_s14 }
  0xd0   : >> { %p1138_p12 = scmp.lt.u32.totalorder %s1132_s14, %s234_s0 }
  0xd1   : >> { %p1137_p10 = por %p1136_p9, %p1135_p8 }
  0xd3   : >> { %p1139_p1 = por %p1138_p12, %p1137_p10 }
  0xd5   : >> { %p1140_p3 = pnand %p1139_p1, %p1133_p6 }
  0xd7   : >> { %1143 = shalt.err (!%p1140_p3)  }
  0xd8   : >> { %s1144_s3 = scalar_lea.vmem %s1778_s26, 64  ;;  %p1149_p7 = scmp.lt.s32.totalorder %s1778_s26, %s1707_s22 }
  0xd9   : >> { %p1145_p5 = scmp.ne.s32.totalorder %s1778_s26, %s1144_s3  ;;  %p1150_p11 = scmp.lt.s32.totalorder %s1710_s29, %s1144_s3 }
  0xdb   : >> { %p1151_p13 = por %p1150_p11, %p1149_p7 }
  0xdd   : >> { %p1152_p0 = pnand %p1151_p13, %p1145_p5 }
  0xdf   : >> { %1155 = shalt.err (!%p1152_p0)  }
  0xe0   : >> { %244 = dma.hbm_to_vmem [thread:$0]  %s234_s0, 64, %s1778_s26, [#allocation3], %s2160_s28, %s2160_s28, %s2159_s4 }
  0xe1   : >> { %s865_s25 = sshll.u32 %s248_s19, 5  ;;  %s258_s15 = scalar_lea.vmem [#allocation2], %s257_s30 }
  0xe2   : >> { %s251_s6 = sadd.s32 %s865_s25, %s249_s23  ;;  %s260_s24 = sshll.u32 %s258_s15, 4  ;;  %s261_s24 = int_to_ptr.vmem [resolvable:$true] %s260_s24 }
  0xe3   : >> { %s866_s21 = sshll.u32 %s251_s6, 4  ;;  %s264_s16 = sadd.s32 6, %s1677_s8 }
  0xe4   : >> { %s253_s9 = scalar_lea.hbm %s2114_s2, %s866_s21 }
  0xe5   : >> { %s1156_s27 = scalar_lea.hbm %s253_s9, 64  ;;  %p1159_p4 = scmp.lt.u32.totalorder %s253_s9, %s2114_s2 }
  0xe6   : >> { %p1157_p2 = scmp.ne.s32.totalorder %s253_s9, %s1156_s27  ;;  %p1160_p6 = scmp.lt.u32.totalorder %s1699_s18, %s1156_s27 }
  0xe7   : >> { %p1162_p9 = scmp.lt.u32.totalorder %s1156_s27, %s253_s9 }
  0xe8   : >> { %p1161_p8 = por %p1160_p6, %p1159_p4 }
  0xea   : >> { %p1163_p10 = por %p1162_p9, %p1161_p8 }
  0xec   : >> { %p1164_p12 = pnand %p1163_p10, %p1157_p2 }
  0xee   : >> { %1167 = shalt.err (!%p1164_p12)  }
  0xef   : >> { %s1168_s23 = scalar_lea.vmem %s261_s24, 64  ;;  %p1173_p3 = scmp.lt.s32.totalorder %s261_s24, %s1707_s22 }
  0xf0   : >> { %p1169_p1 = scmp.ne.s32.totalorder %s261_s24, %s1168_s23  ;;  %p1174_p5 = scmp.lt.s32.totalorder %s1710_s29, %s1168_s23 }
  0xf2   : >> { %p1175_p7 = por %p1174_p5, %p1173_p3 }
  0xf4   : >> { %p1176_p11 = pnand %p1175_p7, %p1169_p1 }
  0xf6   : >> { %1179 = shalt.err (!%p1176_p11)  }
  0xf7   : >> { %263 = dma.hbm_to_vmem [thread:$0]  %s253_s9, 64, %s261_s24, [#allocation3], %s2160_s28, %s2160_s28, %s2159_s4 }
  0xf8   : >> { %s265_s26 = sadd.s32 %s1665_s10, %s264_s16  ;;  %s273_s30 = sshrl.u32 %s264_s16, 3 }
  0xf9   : >> { %s266_s19 = sld [smem:[#allocation5 + %s265_s26]]  ;;  %s274_s17 = sand.u32 7, %s264_s16  }
  0xfa   : >> { %s870_s0 = sshll.u32 %s273_s30, 5  ;;  %s283_s14 = sadd.s32 7, %s1677_s8 }
  0xfb   : >> { %s276_s5 = sadd.s32 %s870_s0, %s274_s17  ;;  %s284_s3 = sadd.s32 %s1665_s10, %s283_s14 }
  0xfc   : >> { %s1814_s25 = sld [smem:[#allocation5 + %s284_s3]]  ;;  %s277_s6 = scalar_lea.vmem [#allocation2], %s276_s5 }
  0xfd   : >> { %s279_s15 = sshll.u32 %s277_s6, 4  ;;  %s292_s21 = sshrl.u32 %s283_s14, 3  ;;  %s1816_s15 = int_to_ptr.vmem [resolvable:$true] %s279_s15 }
  0xfe   : >> { %s293_s20 = sand.u32 7, %s283_s14   ;;  %s873_s27 = sshll.u32 %s292_s21, 5 }
  0xff   : >> { %s267_s24 = sshrl.u32 %s266_s19, 3  ;;  %s268_s1 = sand.u32 7, %s266_s19  }
 0x100   : >> { %s868_s9 = sshll.u32 %s267_s24, 5  ;;  %s295_s12 = sadd.s32 %s873_s27, %s293_s20 }
 0x101   : >> { %s270_s16 = sadd.s32 %s868_s9, %s268_s1 }
 0x102   : >> { %s869_s8 = sshll.u32 %s270_s16, 4  ;;  %s286_s7 = sshrl.u32 %s1814_s25, 3 }
 0x103   : >> { %s272_s30 = scalar_lea.hbm %s2114_s2, %s869_s8  ;;  %s287_s17 = sand.u32 7, %s1814_s25  }
 0x104   : >> { %s1180_s0 = scalar_lea.hbm %s272_s30, 64  ;;  %p1183_p0 = scmp.lt.u32.totalorder %s272_s30, %s2114_s2 }
 0x105   : >> { %p1181_p13 = scmp.ne.s32.totalorder %s272_s30, %s1180_s0  ;;  %p1184_p2 = scmp.lt.u32.totalorder %s1699_s18, %s1180_s0 }
 0x106   : >> { %p1186_p6 = scmp.lt.u32.totalorder %s1180_s0, %s272_s30 }
 0x107   : >> { %p1185_p4 = por %p1184_p2, %p1183_p0 }
 0x109   : >> { %p1187_p8 = por %p1186_p6, %p1185_p4 }
 0x10b   : >> { %p1188_p9 = pnand %p1187_p8, %p1181_p13 }
 0x10d   : >> { %1191 = shalt.err (!%p1188_p9)  }
 0x10e   : >> { %s1192_s19 = scalar_lea.vmem %s1816_s15, 64  ;;  %p1197_p12 = scmp.lt.s32.totalorder %s1816_s15, %s1707_s22 }
 0x10f   : >> { %p1193_p10 = scmp.ne.s32.totalorder %s1816_s15, %s1192_s19  ;;  %p1198_p1 = scmp.lt.s32.totalorder %s1710_s29, %s1192_s19 }
 0x111   : >> { %p1199_p3 = por %p1198_p1, %p1197_p12 }
 0x113   : >> { %p1200_p5 = pnand %p1199_p3, %p1193_p10 }
 0x115   : >> { %1203 = shalt.err (!%p1200_p5)  }
 0x116   : >> { %282 = dma.hbm_to_vmem [thread:$0]  %s272_s30, 64, %s1816_s15, [#allocation3], %s2160_s28, %s2160_s28, %s2159_s4 }
 0x117   : >> { %s871_s14 = sshll.u32 %s286_s7, 5  ;;  %s296_s6 = scalar_lea.vmem [#allocation2], %s295_s12 }
 0x118   : >> { %s289_s25 = sadd.s32 %s871_s14, %s287_s17  ;;  %s298_s21 = sshll.u32 %s296_s6, 4  ;;  %s299_s21 = int_to_ptr.vmem [resolvable:$true] %s298_s21 }
 0x119   : >> { %s872_s20 = sshll.u32 %s289_s25, 4 }
 0x11a   : >> { %s291_s9 = scalar_lea.hbm %s2114_s2, %s872_s20 }
 0x11b   : >> { %s1204_s27 = scalar_lea.hbm %s291_s9, 64  ;;  %p1207_p11 = scmp.lt.u32.totalorder %s291_s9, %s2114_s2 }
 0x11c   : >> { %p1205_p7 = scmp.ne.s32.totalorder %s291_s9, %s1204_s27  ;;  %p1208_p13 = scmp.lt.u32.totalorder %s1699_s18, %s1204_s27 }
 0x11d   : >> { %p1210_p2 = scmp.lt.u32.totalorder %s1204_s27, %s291_s9 }
 0x11e   : >> { %p1209_p0 = por %p1208_p13, %p1207_p11 }
 0x120   : >> { %p1211_p4 = por %p1210_p2, %p1209_p0 }
 0x122   : >> { %p1212_p6 = pnand %p1211_p4, %p1205_p7 }
 0x124   : >> { %1215 = shalt.err (!%p1212_p6)  }
 0x125   : >> { %s1216_s15 = scalar_lea.vmem %s299_s21, 64  ;;  %p1221_p9 = scmp.lt.s32.totalorder %s299_s21, %s1707_s22 }
 0x126   : >> { %p1217_p8 = scmp.ne.s32.totalorder %s299_s21, %s1216_s15  ;;  %p1222_p10 = scmp.lt.s32.totalorder %s1710_s29, %s1216_s15 }
 0x128   : >> { %p1223_p12 = por %p1222_p10, %p1221_p9 }
 0x12a   : >> { %p1224_p1 = pnand %p1223_p12, %p1217_p8 }
 0x12c   : >> { %1227 = shalt.err (!%p1224_p1)  }
 0x12d   : >> { %301 = dma.hbm_to_vmem [thread:$0]  %s291_s9, 64, %s299_s21, [#allocation3], %s2160_s28, %s2160_s28, %s2159_s4 }
 0x12e   : >> { %s149_s11 = sadd.s32 1, %s1520_s11  }
 0x12f   : >> { %p146_p3 = scmp.ge.s32.totalorder %s149_s11, 4  }
 0x130   : > { %s1851_s12 = smov (%p146_p3), 0  }
 0x131   : > { %148 = sbr.rel (!%p146_p3) target bundleno = 81 (0x51), region = 112 }
 0x138 LB: >> { %s2161_s10 = sld [smem:[#allocation41_spill]]  ;;  %s1860_s4 = sshll.u32 %s1524_s12, 3  ;;  %s1524_s12 = sphi %s1851_s12, %s307_s12  }
 0x139   : >> { %s318_s28 = sshrl.u32 %s1860_s4, 3  ;;  %s319_s26 = sand.u32 7, %s1860_s4  }
 0x13a   : >> { %s877_s30 = sshll.u32 %s318_s28, 5  ;;  %s1867_s17 = sadd.s32 1, %s1860_s4 }
 0x13b   : >> { %s729_s0 = sadd.s32 %s877_s30, %s319_s26  ;;  %s339_s25 = sshrl.u32 %s1867_s17, 3 }
 0x13c   : >> { %s730_s19 = scalar_lea.vmem [#allocation2], %s729_s0  ;;  %s340_s21 = sand.u32 7, %s1867_s17  }
 0x13d   : >> { %s731_s14 = scalar_lea.vmem %s730_s19, 128 [#allocation2]  ;;  %s880_s27 = sshll.u32 %s339_s25, 5 }
 0x13e   : >> { %s1857_s7 = sadd.s32 32, %s2161_s10  ;;  %s326_s6 = sshll.u32 %s731_s14, 4  ;;  %s327_s6 = int_to_ptr.vmem [resolvable:$true] %s326_s6 }
 0x13f   : >> { %s310_s11 = sadd.s32 %s1860_s4, %s1857_s7  ;;  %s331_s5 = sadd.s32 %s1867_s17, %s1857_s7 }
 0x140   : >> { %s311_s23 = sld [smem:[#allocation5 + %s310_s11]] }
 0x141   : >> { %s1871_s3 = sld [smem:[#allocation5 + %s331_s5]] }
 0x146   : >> { %s312_s20 = sshrl.u32 %s311_s23, 3  ;;  %s313_s24 = sand.u32 7, %s311_s23  }
 0x147   : >> { %s875_s1 = sshll.u32 %s312_s20, 5  ;;  %s333_s8 = sshrl.u32 %s1871_s3, 3 }
 0x148   : >> { %s315_s9 = sadd.s32 %s875_s1, %s313_s24  ;;  %s334_s26 = sand.u32 7, %s1871_s3  }
 0x149   : >> { %s876_s16 = sshll.u32 %s315_s9, 4 }
 0x14a   : >> { %s317_s28 = scalar_lea.hbm %s2114_s2, %s876_s16 }
 0x14b   : >> { %s1228_s30 = scalar_lea.hbm %s317_s28, 64  ;;  %p1231_p7 = scmp.lt.u32.totalorder %s317_s28, %s2114_s2 }
 0x14c   : >> { %p1229_p5 = scmp.ne.s32.totalorder %s317_s28, %s1228_s30  ;;  %p1232_p11 = scmp.lt.u32.totalorder %s1699_s18, %s1228_s30 }
 0x14d   : >> { %p1234_p0 = scmp.lt.u32.totalorder %s1228_s30, %s317_s28 }
 0x14e   : >> { %p1233_p13 = por %p1232_p11, %p1231_p7 }
 0x150   : >> { %p1235_p2 = por %p1234_p0, %p1233_p13 }
 0x152   : >> { %p1236_p4 = pnand %p1235_p2, %p1229_p5 }
 0x154   : >> { %1239 = shalt.err (!%p1236_p4)  }
 0x155   : >> { %s1240_s23 = scalar_lea.vmem %s327_s6, 64  ;;  %p1245_p8 = scmp.lt.s32.totalorder %s327_s6, %s1707_s22 }
 0x156   : >> { %p1241_p6 = scmp.ne.s32.totalorder %s327_s6, %s1240_s23  ;;  %p1246_p9 = scmp.lt.s32.totalorder %s1710_s29, %s1240_s23 }
 0x158   : >> { %p1247_p10 = por %p1246_p9, %p1245_p8 }
 0x15a   : >> { %p1248_p12 = pnand %p1247_p10, %p1241_p6 }
 0x15c   : >> { %1251 = shalt.err (!%p1248_p12)  }
 0x15d   : >> { %s1533_s3 = smov 128   ;;  %s1534_s19 = smov 1  }
 0x15e   : >> { %329 = dma.hbm_to_vmem [thread:$0]  %s317_s28, 64, %s327_s6, [#allocation3 + $0x1], %s1533_s3, %s1533_s3, %s1534_s19 }
 0x15f   : >> { %s878_s14 = sshll.u32 %s333_s8, 5  ;;  %s737_s25 = sadd.s32 %s880_s27, %s340_s21 }
 0x160   : >> { %s336_s20 = sadd.s32 %s878_s14, %s334_s26  ;;  %s738_s1 = scalar_lea.vmem [#allocation2], %s737_s25 }
 0x161   : >> { %s879_s24 = sshll.u32 %s336_s20, 4  ;;  %s739_s9 = scalar_lea.vmem %s738_s1, 128 [#allocation2] }
 0x162   : >> { %s338_s11 = scalar_lea.hbm %s2114_s2, %s879_s24  ;;  %s346_s30 = sshll.u32 %s739_s9, 4  ;;  %s347_s30 = int_to_ptr.vmem [resolvable:$true] %s346_s30 }
 0x163   : >> { %s350_s0 = sadd.s32 2, %s1860_s4  ;;  %s1252_s5 = scalar_lea.hbm %s338_s11, 64 }
 0x164   : >> { %p1253_p1 = scmp.ne.s32.totalorder %s338_s11, %s1252_s5  ;;  %p1255_p3 = scmp.lt.u32.totalorder %s338_s11, %s2114_s2 }
 0x165   : >> { %p1256_p5 = scmp.lt.u32.totalorder %s1699_s18, %s1252_s5  ;;  %p1258_p11 = scmp.lt.u32.totalorder %s1252_s5, %s338_s11 }
 0x167   : >> { %p1257_p7 = por %p1256_p5, %p1255_p3 }
 0x169   : >> { %p1259_p13 = por %p1258_p11, %p1257_p7 }
 0x16b   : >> { %p1260_p0 = pnand %p1259_p13, %p1253_p1 }
 0x16d   : >> { %1263 = shalt.err (!%p1260_p0)  }
 0x16e   : >> { %s1264_s17 = scalar_lea.vmem %s347_s30, 64  ;;  %p1269_p4 = scmp.lt.s32.totalorder %s347_s30, %s1707_s22 }
 0x16f   : >> { %p1265_p2 = scmp.ne.s32.totalorder %s347_s30, %s1264_s17  ;;  %p1270_p6 = scmp.lt.s32.totalorder %s1710_s29, %s1264_s17 }
 0x171   : >> { %p1271_p8 = por %p1270_p6, %p1269_p4 }
 0x173   : >> { %p1272_p9 = pnand %p1271_p8, %p1265_p2 }
 0x175   : >> { %1275 = shalt.err (!%p1272_p9)  }
 0x176   : >> { %349 = dma.hbm_to_vmem [thread:$0]  %s338_s11, 64, %s347_s30, [#allocation3 + $0x1], %s1533_s3, %s1533_s3, %s1534_s19 }
 0x177   : >> { %s351_s10 = sadd.s32 %s350_s0, %s1857_s7  ;;  %s359_s6 = sshrl.u32 %s350_s0, 3 }
 0x178   : >> { %s352_s21 = sld [smem:[#allocation5 + %s351_s10]]  ;;  %s360_s27 = sand.u32 7, %s350_s0  }
 0x179   : >> { %s883_s8 = sshll.u32 %s359_s6, 5  ;;  %s1906_s28 = sadd.s32 3, %s1860_s4 }
 0x17a   : >> { %s745_s26 = sadd.s32 %s883_s8, %s360_s27  ;;  %s371_s14 = sadd.s32 %s1906_s28, %s1857_s7 }
 0x17b   : >> { %s1910_s25 = sld [smem:[#allocation5 + %s371_s14]]  ;;  %s746_s20 = scalar_lea.vmem [#allocation2], %s745_s26 }
 0x17c   : >> { %s747_s24 = scalar_lea.vmem %s746_s20, 128 [#allocation2]  ;;  %s379_s1 = sshrl.u32 %s1906_s28, 3 }
 0x17d   : >> { %s366_s9 = sshll.u32 %s747_s24, 4  ;;  %s380_s16 = sand.u32 7, %s1906_s28   ;;  %s367_s9 = int_to_ptr.vmem [resolvable:$true] %s366_s9 }
 0x17e   : >> { %s353_s15 = sshrl.u32 %s352_s21, 3  ;;  %s354_s11 = sand.u32 7, %s352_s21  }
 0x17f   : >> { %s881_s30 = sshll.u32 %s353_s15, 5  ;;  %s886_s5 = sshll.u32 %s379_s1, 5 }
 0x180   : >> { %s356_s0 = sadd.s32 %s881_s30, %s354_s11 }
 0x181   : >> { %s882_s23 = sshll.u32 %s356_s0, 4  ;;  %s373_s17 = sshrl.u32 %s1910_s25, 3 }
 0x182   : >> { %s358_s27 = scalar_lea.hbm %s2114_s2, %s882_s23  ;;  %s374_s8 = sand.u32 7, %s1910_s25  }
 0x183   : >> { %s1276_s14 = scalar_lea.hbm %s358_s27, 64  ;;  %p1279_p12 = scmp.lt.u32.totalorder %s358_s27, %s2114_s2 }
 0x184   : >> { %p1277_p10 = scmp.ne.s32.totalorder %s358_s27, %s1276_s14  ;;  %p1280_p1 = scmp.lt.u32.totalorder %s1699_s18, %s1276_s14 }
 0x185   : >> { %p1282_p5 = scmp.lt.u32.totalorder %s1276_s14, %s358_s27 }
 0x186   : >> { %p1281_p3 = por %p1280_p1, %p1279_p12 }
 0x188   : >> { %p1283_p7 = por %p1282_p5, %p1281_p3 }
 0x18a   : >> { %p1284_p11 = pnand %p1283_p7, %p1277_p10 }
 0x18c   : >> { %1287 = shalt.err (!%p1284_p11)  }
 0x18d   : >> { %s1288_s21 = scalar_lea.vmem %s367_s9, 64  ;;  %p1293_p0 = scmp.lt.s32.totalorder %s367_s9, %s1707_s22 }
 0x18e   : >> { %p1289_p13 = scmp.ne.s32.totalorder %s367_s9, %s1288_s21  ;;  %p1294_p2 = scmp.lt.s32.totalorder %s1710_s29, %s1288_s21 }
 0x190   : >> { %p1295_p4 = por %p1294_p2, %p1293_p0 }
 0x192   : >> { %p1296_p6 = pnand %p1295_p4, %p1289_p13 }
 0x194   : >> { %1299 = shalt.err (!%p1296_p6)  }
 0x195   : >> { %369 = dma.hbm_to_vmem [thread:$0]  %s358_s27, 64, %s367_s9, [#allocation3 + $0x1], %s1533_s3, %s1533_s3, %s1534_s19 }
 0x196   : >> { %s884_s25 = sshll.u32 %s373_s17, 5  ;;  %s753_s24 = sadd.s32 %s886_s5, %s380_s16 }
 0x197   : >> { %s376_s1 = sadd.s32 %s884_s25, %s374_s8  ;;  %s754_s11 = scalar_lea.vmem [#allocation2], %s753_s24 }
 0x198   : >> { %s885_s15 = sshll.u32 %s376_s1, 4  ;;  %s755_s30 = scalar_lea.vmem %s754_s11, 128 [#allocation2] }
 0x199   : >> { %s378_s10 = scalar_lea.hbm %s2114_s2, %s885_s15  ;;  %s386_s6 = sshll.u32 %s755_s30, 4  ;;  %s387_s6 = int_to_ptr.vmem [resolvable:$true] %s386_s6 }
 0x19a   : >> { %s390_s14 = sadd.s32 4, %s1860_s4  ;;  %s1300_s26 = scalar_lea.hbm %s378_s10, 64 }
 0x19b   : >> { %p1301_p8 = scmp.ne.s32.totalorder %s378_s10, %s1300_s26  ;;  %p1303_p9 = scmp.lt.u32.totalorder %s378_s10, %s2114_s2 }
 0x19c   : >> { %p1304_p10 = scmp.lt.u32.totalorder %s1699_s18, %s1300_s26  ;;  %p1306_p1 = scmp.lt.u32.totalorder %s1300_s26, %s378_s10 }
 0x19e   : >> { %p1305_p12 = por %p1304_p10, %p1303_p9 }
 0x1a0   : >> { %p1307_p3 = por %p1306_p1, %p1305_p12 }
 0x1a2   : >> { %p1308_p5 = pnand %p1307_p3, %p1301_p8 }
 0x1a4   : >> { %1311 = shalt.err (!%p1308_p5)  }
 0x1a5   : >> { %s1312_s28 = scalar_lea.vmem %s387_s6, 64  ;;  %p1317_p11 = scmp.lt.s32.totalorder %s387_s6, %s1707_s22 }
 0x1a6   : >> { %p1313_p7 = scmp.ne.s32.totalorder %s387_s6, %s1312_s28  ;;  %p1318_p13 = scmp.lt.s32.totalorder %s1710_s29, %s1312_s28 }
 0x1a8   : >> { %p1319_p0 = por %p1318_p13, %p1317_p11 }
 0x1aa   : >> { %p1320_p2 = pnand %p1319_p0, %p1313_p7 }
 0x1ac   : >> { %1323 = shalt.err (!%p1320_p2)  }
 0x1ad   : >> { %389 = dma.hbm_to_vmem [thread:$0]  %s378_s10, 64, %s387_s6, [#allocation3 + $0x1], %s1533_s3, %s1533_s3, %s1534_s19 }
 0x1ae   : >> { %s391_s9 = sadd.s32 %s390_s14, %s1857_s7  ;;  %s399_s16 = sshrl.u32 %s390_s14, 3 }
 0x1af   : >> { %s392_s5 = sld [smem:[#allocation5 + %s391_s9]]  ;;  %s400_s17 = sand.u32 7, %s390_s14  }
 0x1b0   : >> { %s889_s27 = sshll.u32 %s399_s16, 5  ;;  %s1945_s8 = sadd.s32 5, %s1860_s4 }
 0x1b1   : >> { %s761_s25 = sadd.s32 %s889_s27, %s400_s17  ;;  %s411_s24 = sadd.s32 %s1945_s8, %s1857_s7 }
 0x1b2   : >> { %s1949_s1 = sld [smem:[#allocation5 + %s411_s24]]  ;;  %s762_s15 = scalar_lea.vmem [#allocation2], %s761_s25 }
 0x1b3   : >> { %s763_s11 = scalar_lea.vmem %s762_s15, 128 [#allocation2]  ;;  %s419_s30 = sshrl.u32 %s1945_s8, 3 }
 0x1b4   : >> { %s406_s0 = sshll.u32 %s763_s11, 4  ;;  %s420_s23 = sand.u32 7, %s1945_s8   ;;  %s407_s0 = int_to_ptr.vmem [resolvable:$true] %s406_s0 }
 0x1b5   : >> { %s393_s10 = sshrl.u32 %s392_s5, 3  ;;  %s394_s6 = sand.u32 7, %s392_s5  }
 0x1b6   : >> { %s887_s14 = sshll.u32 %s393_s10, 5  ;;  %s892_s20 = sshll.u32 %s419_s30, 5 }
 0x1b7   : >> { %s396_s26 = sadd.s32 %s887_s14, %s394_s6 }
 0x1b8   : >> { %s888_s21 = sshll.u32 %s396_s26, 4  ;;  %s413_s28 = sshrl.u32 %s1949_s1, 3 }
 0x1b9   : >> { %s398_s17 = scalar_lea.hbm %s2114_s2, %s888_s21  ;;  %s414_s27 = sand.u32 7, %s1949_s1  }
 0x1ba   : >> { %s1324_s24 = scalar_lea.hbm %s398_s17, 64  ;;  %p1327_p6 = scmp.lt.u32.totalorder %s398_s17, %s2114_s2 }
 0x1bb   : >> { %p1325_p4 = scmp.ne.s32.totalorder %s398_s17, %s1324_s24  ;;  %p1328_p8 = scmp.lt.u32.totalorder %s1699_s18, %s1324_s24 }
 0x1bc   : >> { %p1330_p10 = scmp.lt.u32.totalorder %s1324_s24, %s398_s17 }
 0x1bd   : >> { %p1329_p9 = por %p1328_p8, %p1327_p6 }
 0x1bf   : >> { %p1331_p12 = por %p1330_p10, %p1329_p9 }
 0x1c1   : >> { %p1332_p1 = pnand %p1331_p12, %p1325_p4 }
 0x1c3   : >> { %1335 = shalt.err (!%p1332_p1)  }
 0x1c4   : >> { %s1336_s5 = scalar_lea.vmem %s407_s0, 64  ;;  %p1341_p5 = scmp.lt.s32.totalorder %s407_s0, %s1707_s22 }
 0x1c5   : >> { %p1337_p3 = scmp.ne.s32.totalorder %s407_s0, %s1336_s5  ;;  %p1342_p7 = scmp.lt.s32.totalorder %s1710_s29, %s1336_s5 }
 0x1c7   : >> { %p1343_p11 = por %p1342_p7, %p1341_p5 }
 0x1c9   : >> { %p1344_p13 = pnand %p1343_p11, %p1337_p3 }
 0x1cb   : >> { %1347 = shalt.err (!%p1344_p13)  }
 0x1cc   : >> { %409 = dma.hbm_to_vmem [thread:$0]  %s398_s17, 64, %s407_s0, [#allocation3 + $0x1], %s1533_s3, %s1533_s3, %s1534_s19 }
 0x1cd   : >> { %s890_s1 = sshll.u32 %s413_s28, 5  ;;  %s769_s11 = sadd.s32 %s892_s20, %s420_s23 }
 0x1ce   : >> { %s416_s30 = sadd.s32 %s890_s1, %s414_s27  ;;  %s770_s6 = scalar_lea.vmem [#allocation2], %s769_s11 }
 0x1cf   : >> { %s891_s10 = sshll.u32 %s416_s30, 4  ;;  %s771_s14 = scalar_lea.vmem %s770_s6, 128 [#allocation2] }
 0x1d0   : >> { %s418_s9 = scalar_lea.hbm %s2114_s2, %s891_s10  ;;  %s426_s16 = sshll.u32 %s771_s14, 4  ;;  %s427_s16 = int_to_ptr.vmem [resolvable:$true] %s426_s16 }
 0x1d1   : >> { %s430_s24 = sadd.s32 6, %s1860_s4  ;;  %s1348_s25 = scalar_lea.hbm %s418_s9, 64 }
 0x1d2   : >> { %p1349_p0 = scmp.ne.s32.totalorder %s418_s9, %s1348_s25  ;;  %p1351_p2 = scmp.lt.u32.totalorder %s418_s9, %s2114_s2 }
 0x1d3   : >> { %p1352_p4 = scmp.lt.u32.totalorder %s1699_s18, %s1348_s25  ;;  %p1354_p8 = scmp.lt.u32.totalorder %s1348_s25, %s418_s9 }
 0x1d5   : >> { %p1353_p6 = por %p1352_p4, %p1351_p2 }
 0x1d7   : >> { %p1355_p9 = por %p1354_p8, %p1353_p6 }
 0x1d9   : >> { %p1356_p10 = pnand %p1355_p9, %p1349_p0 }
 0x1db   : >> { %1359 = shalt.err (!%p1356_p10)  }
 0x1dc   : >> { %s1360_s8 = scalar_lea.vmem %s427_s16, 64  ;;  %p1365_p1 = scmp.lt.s32.totalorder %s427_s16, %s1707_s22 }
 0x1dd   : >> { %p1361_p12 = scmp.ne.s32.totalorder %s427_s16, %s1360_s8  ;;  %p1366_p3 = scmp.lt.s32.totalorder %s1710_s29, %s1360_s8 }
 0x1df   : >> { %p1367_p5 = por %p1366_p3, %p1365_p1 }
 0x1e1   : >> { %p1368_p7 = pnand %p1367_p5, %p1361_p12 }
 0x1e3   : >> { %1371 = shalt.err (!%p1368_p7)  }
 0x1e4   : >> { %429 = dma.hbm_to_vmem [thread:$0]  %s418_s9, 64, %s427_s16, [#allocation3 + $0x1], %s1533_s3, %s1533_s3, %s1534_s19 }
 0x1e5   : >> { %s431_s0 = sadd.s32 %s430_s24, %s1857_s7  ;;  %s439_s23 = sshrl.u32 %s430_s24, 3 }
 0x1e6   : >> { %s432_s20 = sld [smem:[#allocation5 + %s431_s0]]  ;;  %s440_s28 = sand.u32 7, %s430_s24  }
 0x1e7   : >> { %s895_s17 = sshll.u32 %s439_s23, 5  ;;  %s1984_s27 = sadd.s32 7, %s1860_s4 }
 0x1e8   : >> { %s777_s1 = sadd.s32 %s895_s17, %s440_s28  ;;  %s451_s11 = sadd.s32 %s1984_s27, %s1857_s7 }
 0x1e9   : >> { %s1988_s30 = sld [smem:[#allocation5 + %s451_s11]]  ;;  %s778_s10 = scalar_lea.vmem [#allocation2], %s777_s1 }
 0x1ea   : >> { %s779_s6 = scalar_lea.vmem %s778_s10, 128 [#allocation2]  ;;  %s459_s14 = sshrl.u32 %s1984_s27, 3 }
 0x1eb   : >> { %s446_s26 = sshll.u32 %s779_s6, 4  ;;  %s460_s21 = sand.u32 7, %s1984_s27   ;;  %s447_s26 = int_to_ptr.vmem [resolvable:$true] %s446_s26 }
 0x1ec   : >> { %s433_s9 = sshrl.u32 %s432_s20, 3  ;;  %s434_s16 = sand.u32 7, %s432_s20  }
 0x1ed   : >> { %s893_s24 = sshll.u32 %s433_s9, 5  ;;  %s898_s25 = sshll.u32 %s459_s14, 5 }
 0x1ee   : >> { %s436_s4 = sadd.s32 %s893_s24, %s434_s16 }
 0x1ef   : >> { %s894_s15 = sshll.u32 %s436_s4, 4  ;;  %s453_s5 = sshrl.u32 %s1988_s30, 3 }
 0x1f0   : >> { %s438_s0 = scalar_lea.hbm %s2114_s2, %s894_s15  ;;  %s454_s23 = sand.u32 7, %s1988_s30  }
 0x1f1   : >> { %s1372_s28 = scalar_lea.hbm %s438_s0, 64  ;;  %p1375_p13 = scmp.lt.u32.totalorder %s438_s0, %s2114_s2 }
 0x1f2   : >> { %p1373_p11 = scmp.ne.s32.totalorder %s438_s0, %s1372_s28  ;;  %p1376_p0 = scmp.lt.u32.totalorder %s1699_s18, %s1372_s28 }
 0x1f3   : >> { %p1378_p4 = scmp.lt.u32.totalorder %s1372_s28, %s438_s0 }
 0x1f4   : >> { %p1377_p2 = por %p1376_p0, %p1375_p13 }
 0x1f6   : >> { %p1379_p6 = por %p1378_p4, %p1377_p2 }
 0x1f8   : >> { %p1380_p8 = pnand %p1379_p6, %p1373_p11 }
 0x1fa   : >> { %1383 = shalt.err (!%p1380_p8)  }
 0x1fb   : >> { %s1384_s20 = scalar_lea.vmem %s447_s26, 64  ;;  %p1389_p10 = scmp.lt.s32.totalorder %s447_s26, %s1707_s22 }
 0x1fc   : >> { %p1385_p9 = scmp.ne.s32.totalorder %s447_s26, %s1384_s20  ;;  %p1390_p12 = scmp.lt.s32.totalorder %s1710_s29, %s1384_s20 }
 0x1fe   : >> { %p1391_p1 = por %p1390_p12, %p1389_p10 }
 0x200   : >> { %p1392_p3 = pnand %p1391_p1, %p1385_p9 }
 0x202   : >> { %1395 = shalt.err (!%p1392_p3)  }
 0x203   : >> { %449 = dma.hbm_to_vmem [thread:$0]  %s438_s0, 64, %s447_s26, [#allocation3 + $0x1], %s1533_s3, %s1533_s3, %s1534_s19 }
 0x204   : >> { %s896_s11 = sshll.u32 %s453_s5, 5  ;;  %s785_s30 = sadd.s32 %s898_s25, %s460_s21 }
 0x205   : >> { %s456_s10 = sadd.s32 %s896_s11, %s454_s23  ;;  %s786_s14 = scalar_lea.vmem [#allocation2], %s785_s30 }
 0x206   : >> { %s897_s6 = sshll.u32 %s456_s10, 4  ;;  %s787_s9 = scalar_lea.vmem %s786_s14, 128 [#allocation2] }
 0x207   : >> { %s458_s4 = scalar_lea.hbm %s2114_s2, %s897_s6  ;;  %s466_s15 = sshll.u32 %s787_s9, 4  ;;  %s467_s15 = int_to_ptr.vmem [resolvable:$true] %s466_s15 }
 0x208   : >> { %s1396_s8 = scalar_lea.hbm %s458_s4, 64  ;;  %p1399_p7 = scmp.lt.u32.totalorder %s458_s4, %s2114_s2 }
 0x209   : >> { %p1397_p5 = scmp.ne.s32.totalorder %s458_s4, %s1396_s8  ;;  %p1400_p11 = scmp.lt.u32.totalorder %s1699_s18, %s1396_s8 }
 0x20a   : >> { %p1402_p0 = scmp.lt.u32.totalorder %s1396_s8, %s458_s4 }
 0x20b   : >> { %p1401_p13 = por %p1400_p11, %p1399_p7 }
 0x20d   : >> { %p1403_p2 = por %p1402_p0, %p1401_p13 }
 0x20f   : >> { %p1404_p4 = pnand %p1403_p2, %p1397_p5 }
 0x211   : >> { %1407 = shalt.err (!%p1404_p4)  }
 0x212   : >> { %s1408_s27 = scalar_lea.vmem %s467_s15, 64  ;;  %p1413_p8 = scmp.lt.s32.totalorder %s467_s15, %s1707_s22 }
 0x213   : >> { %p1409_p6 = scmp.ne.s32.totalorder %s467_s15, %s1408_s27  ;;  %p1414_p9 = scmp.lt.s32.totalorder %s1710_s29, %s1408_s27 }
 0x215   : >> { %p1415_p10 = por %p1414_p9, %p1413_p8 }
 0x217   : >> { %p1416_p12 = pnand %p1415_p10, %p1409_p6 }
 0x219   : >> { %1419 = shalt.err (!%p1416_p12)  }
 0x21a   : >> { %469 = dma.hbm_to_vmem [thread:$0]  %s458_s4, 64, %s467_s15, [#allocation3 + $0x1], %s1533_s3, %s1533_s3, %s1534_s19 }
 0x21b   : >> { %s307_s12 = sadd.s32 1, %s1524_s12  }
 0x21c   : >> { %p304_p1 = scmp.ge.s32.totalorder %s307_s12, 4  }
 0x21e   : > { %306 = sbr.rel (!%p304_p1) target bundleno = 312 (0x138), region = 123 }
 0x225   : > { %1486 = dma.done.wait [#allocation3], 2048 }
 0x226   : > { %1487 = vsyncadd [#allocation3], 4294965248  ;;  %v474_v0 = vld [vmem:[#allocation2] sm:$0xff]  ;;  %v475_v2 = vld [vmem:[#allocation2 + $0x8] sm:$0xff] }
 0x227   : > { %v490_v1 = vld [vmem:[#allocation6] sm:$0xff]  ;;  %v491_v4 = vld [vmem:[#allocation6 + $0x8] sm:$0xff]  ;;  %v476_v5 = vld [vmem:[#allocation2 + $0x10] sm:$0xff] }
 0x228   : > { %v506_v3 = vadd.f32 %v490_v1, %v474_v0  ;;  %v492_v6 = vld [vmem:[#allocation6 + $0x10] sm:$0xff]  ;;  %v507_v7 = vadd.f32 %v491_v4, %v475_v2  ;;  %v477_v9 = vld [vmem:[#allocation2 + $0x18] sm:$0xff]  ;;  %v478_v11 = vld [vmem:[#allocation2 + $0x20] sm:$0xff] }
 0x229   : > { %v508_v8 = vadd.f32 %v492_v6, %v476_v5  ;;  %v493_v10 = vld [vmem:[#allocation6 + $0x18] sm:$0xff]  ;;  %v494_v13 = vld [vmem:[#allocation6 + $0x20] sm:$0xff]  ;;  %v479_v14 = vld [vmem:[#allocation2 + $0x28] sm:$0xff] }
 0x22a   : > { %522 = vst [vmem:[%s1669_s13] sm:$0xff] %v506_v3  ;;  %v509_v12 = vadd.f32 %v493_v10, %v477_v9  ;;  %v495_v15 = vld [vmem:[#allocation6 + $0x28] sm:$0xff]  ;;  %523 = vst [vmem:[%s1669_s13 + $0x8] sm:$0xff] %v507_v7  ;;  %v510_v16 = vadd.f32 %v494_v13, %v478_v11  ;;  %v480_v18 = vld [vmem:[#allocation2 + $0x30] sm:$0xff] }
 0x22b   : > { %524 = vst [vmem:[%s1669_s13 + $0x10] sm:$0xff] %v508_v8  ;;  %v511_v17 = vadd.f32 %v495_v15, %v479_v14  ;;  %v496_v19 = vld [vmem:[#allocation6 + $0x30] sm:$0xff]  ;;  %v481_v20 = vld [vmem:[#allocation2 + $0x38] sm:$0xff]  ;;  %v482_v23 = vld [vmem:[#allocation2 + $0x40] sm:$0xff] }
 0x22c   : > { %525 = vst [vmem:[%s1669_s13 + $0x18] sm:$0xff] %v509_v12  ;;  %v512_v21 = vadd.f32 %v496_v19, %v480_v18  ;;  %v497_v22 = vld [vmem:[#allocation6 + $0x38] sm:$0xff]  ;;  %v498_v24 = vld [vmem:[#allocation6 + $0x40] sm:$0xff]  ;;  %526 = vst [vmem:[%s1669_s13 + $0x20] sm:$0xff] %v510_v16 }
 0x22d   : > { %527 = vst [vmem:[%s1669_s13 + $0x28] sm:$0xff] %v511_v17  ;;  %v513_v25 = vadd.f32 %v497_v22, %v481_v20  ;;  %v514_v26 = vadd.f32 %v498_v24, %v482_v23  ;;  %v483_v27 = vld [vmem:[#allocation2 + $0x48] sm:$0xff]  ;;  %v484_v29 = vld [vmem:[#allocation2 + $0x50] sm:$0xff]  ;;  %v485_v32 = vld [vmem:[#allocation2 + $0x58] sm:$0xff] }
 0x22e   : > { %v499_v28 = vld [vmem:[#allocation6 + $0x48] sm:$0xff]  ;;  %528 = vst [vmem:[%s1669_s13 + $0x30] sm:$0xff] %v512_v21  ;;  %v500_v31 = vld [vmem:[#allocation6 + $0x50] sm:$0xff]  ;;  %v501_v33 = vld [vmem:[#allocation6 + $0x58] sm:$0xff] }
 0x22f   : > { %v515_v30 = vadd.f32 %v499_v28, %v483_v27  ;;  %529 = vst [vmem:[%s1669_s13 + $0x38] sm:$0xff] %v513_v25  ;;  %530 = vst [vmem:[%s1669_s13 + $0x40] sm:$0xff] %v514_v26  ;;  %v516_v34 = vadd.f32 %v500_v31, %v484_v29  ;;  %v517_v35 = vadd.f32 %v501_v33, %v485_v32  ;;  %v486_v36 = vld [vmem:[#allocation2 + $0x60] sm:$0xff]  ;;  %v487_v38 = vld [vmem:[#allocation2 + $0x68] sm:$0xff] }
 0x230   : > { %v502_v37 = vld [vmem:[#allocation6 + $0x60] sm:$0xff]  ;;  %v503_v40 = vld [vmem:[#allocation6 + $0x68] sm:$0xff]  ;;  %v488_v41 = vld [vmem:[#allocation2 + $0x70] sm:$0xff] }
 0x231   : > { %531 = vst [vmem:[%s1669_s13 + $0x48] sm:$0xff] %v515_v30  ;;  %v518_v39 = vadd.f32 %v502_v37, %v486_v36  ;;  %v504_v42 = vld [vmem:[#allocation6 + $0x70] sm:$0xff]  ;;  %532 = vst [vmem:[%s1669_s13 + $0x50] sm:$0xff] %v516_v34  ;;  %v519_v43 = vadd.f32 %v503_v40, %v487_v38  ;;  %v489_v45 = vld [vmem:[#allocation2 + $0x78] sm:$0xff] }
 0x232   : > { %533 = vst [vmem:[%s1669_s13 + $0x58] sm:$0xff] %v517_v35  ;;  %v520_v44 = vadd.f32 %v504_v42, %v488_v41  ;;  %v505_v46 = vld [vmem:[#allocation6 + $0x78] sm:$0xff] }
 0x233   : > { %534 = vst [vmem:[%s1669_s13 + $0x60] sm:$0xff] %v518_v39  ;;  %v521_v47 = vadd.f32 %v505_v46, %v489_v45  ;;  %535 = vst [vmem:[%s1669_s13 + $0x68] sm:$0xff] %v519_v43 }
 0x234   : > { %536 = vst [vmem:[%s1669_s13 + $0x70] sm:$0xff] %v520_v44 }
 0x235   : > { %537 = vst [vmem:[%s1669_s13 + $0x78] sm:$0xff] %v521_v47 }
 0x236   : > { %1488 = dma.done.wait [#allocation3 + $0x1], 2048 }
 0x237   : > { %1489 = vsyncadd [#allocation3 + $0x1], 4294965248  ;;  %v542_v48 = vld [vmem:[#allocation2 + $0x80] sm:$0xff]  ;;  %v543_v50 = vld [vmem:[#allocation2 + $0x88] sm:$0xff]  ;;  %s2162_s18 = sld [smem:[#allocation34_spill]]  ;;  %s623_s29 = sshll.u32 %s1669_s13, 4  ;;  %s2058_s29 = int_to_ptr.vmem [resolvable:$true] %s623_s29 }
 0x238   : > { %v558_v49 = vld [vmem:[#allocation6 + $0x80] sm:$0xff]  ;;  %v559_v52 = vld [vmem:[#allocation6 + $0x88] sm:$0xff]  ;;  %v544_v53 = vld [vmem:[#allocation2 + $0x90] sm:$0xff]  ;;  %s2163_s12 = sld [smem:[#allocation32_spill]]  ;;  %s2165_s21 = sld [smem:[#allocation43_spill]] }
 0x239   : > { %v574_v51 = vadd.f32 %v558_v49, %v542_v48  ;;  %v560_v54 = vld [vmem:[#allocation6 + $0x90] sm:$0xff]  ;;  %v575_v55 = vadd.f32 %v559_v52, %v543_v50  ;;  %v545_v57 = vld [vmem:[#allocation2 + $0x98] sm:$0xff]  ;;  %v546_v59 = vld [vmem:[#allocation2 + $0xa0] sm:$0xff]  ;;  %s2164_s3 = sld [smem:[#allocation38_spill]]  ;;  %s1420_s23 = scalar_lea.vmem %s2058_s29, 4096 }
 0x23a   : > { %v576_v56 = vadd.f32 %v560_v54, %v544_v53  ;;  %v561_v58 = vld [vmem:[#allocation6 + $0x98] sm:$0xff]  ;;  %v562_v61 = vld [vmem:[#allocation6 + $0xa0] sm:$0xff]  ;;  %v547_v62 = vld [vmem:[#allocation2 + $0xa8] sm:$0xff]  ;;  %p1421_p3 = scmp.ne.s32.totalorder %s2058_s29, %s1420_s23  ;;  %s1535_s17 = smov [#allocation9]  }
 0x23b   : > { %590 = vst [vmem:[%s1669_s13 + $0x80] sm:$0xff] %v574_v51  ;;  %v577_v60 = vadd.f32 %v561_v58, %v545_v57  ;;  %v563_v63 = vld [vmem:[#allocation6 + $0xa8] sm:$0xff]  ;;  %591 = vst [vmem:[%s1669_s13 + $0x88] sm:$0xff] %v575_v55  ;;  %v578_v0 = vadd.f32 %v562_v61, %v546_v59  ;;  %v548_v2 = vld [vmem:[#allocation2 + $0xb0] sm:$0xff]  ;;  %s1424_s1 = sshll.u32 %s1535_s17, 4  ;;  %s1425_s1 = int_to_ptr.vmem [resolvable:$false] %s1424_s1 }
 0x23c   : > { %592 = vst [vmem:[%s1669_s13 + $0x90] sm:$0xff] %v576_v56  ;;  %v579_v1 = vadd.f32 %v563_v63, %v547_v62  ;;  %v564_v3 = vld [vmem:[#allocation6 + $0xb0] sm:$0xff]  ;;  %v549_v4 = vld [vmem:[#allocation2 + $0xb8] sm:$0xff]  ;;  %v550_v7 = vld [vmem:[#allocation2 + $0xc0] sm:$0xff]  ;;  %s1426_s20 = scalar_lea.vmem %s1425_s1, 8192  ;;  %p1427_p13 = scmp.lt.s32.totalorder %s2058_s29, %s1425_s1 }
 0x23d   : > { %593 = vst [vmem:[%s1669_s13 + $0x98] sm:$0xff] %v577_v60  ;;  %v580_v5 = vadd.f32 %v564_v3, %v548_v2  ;;  %v565_v6 = vld [vmem:[#allocation6 + $0xb8] sm:$0xff]  ;;  %v566_v8 = vld [vmem:[#allocation6 + $0xc0] sm:$0xff]  ;;  %594 = vst [vmem:[%s1669_s13 + $0xa0] sm:$0xff] %v578_v0  ;;  %s906_s22 = sshll.u32 %s2162_s18, 12  ;;  %p1428_p0 = scmp.lt.s32.totalorder %s1426_s20, %s1420_s23 }
 0x23e   : > { %595 = vst [vmem:[%s1669_s13 + $0xa8] sm:$0xff] %v579_v1  ;;  %v581_v9 = vadd.f32 %v565_v6, %v549_v4  ;;  %v582_v10 = vadd.f32 %v566_v8, %v550_v7  ;;  %v551_v11 = vld [vmem:[#allocation2 + $0xc8] sm:$0xff]  ;;  %v552_v13 = vld [vmem:[#allocation2 + $0xd0] sm:$0xff]  ;;  %v553_v16 = vld [vmem:[#allocation2 + $0xd8] sm:$0xff]  ;;  %s2056_s25 = scalar_lea.hbm %s2165_s21, %s906_s22  ;;  %s2166_s5 = sand.u32 1, %s2163_s12  }
 0x23f   : > { %v567_v12 = vld [vmem:[#allocation6 + $0xc8] sm:$0xff]  ;;  %596 = vst [vmem:[%s1669_s13 + $0xb0] sm:$0xff] %v580_v5  ;;  %v568_v15 = vld [vmem:[#allocation6 + $0xd0] sm:$0xff]  ;;  %v569_v17 = vld [vmem:[#allocation6 + $0xd8] sm:$0xff]  ;;  %s2066_s0 = scalar_lea.sflag [#allocation8], %s2166_s5  ;;  %p2167_p5 = scmp.ne.s32.totalorder %s2164_s3, 0 }
 0x240   : > { %v583_v14 = vadd.f32 %v567_v12, %v551_v11  ;;  %597 = vst [vmem:[%s1669_s13 + $0xb8] sm:$0xff] %v581_v9  ;;  %598 = vst [vmem:[%s1669_s13 + $0xc0] sm:$0xff] %v582_v10  ;;  %v584_v18 = vadd.f32 %v568_v15, %v552_v13  ;;  %v585_v19 = vadd.f32 %v569_v17, %v553_v16  ;;  %v554_v20 = vld [vmem:[#allocation2 + $0xe0] sm:$0xff]  ;;  %v555_v22 = vld [vmem:[#allocation2 + $0xe8] sm:$0xff]  ;;  %p1429_p2 = por %p1428_p0, %p1427_p13 }
 0x241   : > { %v570_v21 = vld [vmem:[#allocation6 + $0xe0] sm:$0xff]  ;;  %v571_v24 = vld [vmem:[#allocation6 + $0xe8] sm:$0xff]  ;;  %v556_v25 = vld [vmem:[#allocation2 + $0xf0] sm:$0xff]  ;;  %p1422_p7 = pnand %p1421_p3, %p2167_p5 }
 0x242   : > { %599 = vst [vmem:[%s1669_s13 + $0xc8] sm:$0xff] %v583_v14  ;;  %v586_v23 = vadd.f32 %v570_v21, %v554_v20  ;;  %v572_v26 = vld [vmem:[#allocation6 + $0xf0] sm:$0xff]  ;;  %600 = vst [vmem:[%s1669_s13 + $0xd0] sm:$0xff] %v584_v18  ;;  %v587_v27 = vadd.f32 %v571_v24, %v555_v22  ;;  %v557_v29 = vld [vmem:[#allocation2 + $0xf8] sm:$0xff] }
 0x243   : > { %601 = vst [vmem:[%s1669_s13 + $0xd8] sm:$0xff] %v585_v19  ;;  %v588_v28 = vadd.f32 %v572_v26, %v556_v25  ;;  %v573_v30 = vld [vmem:[#allocation6 + $0xf8] sm:$0xff]  ;;  %p1423_p11 = pneg %p1422_p7 }
 0x244   : > { %602 = vst [vmem:[%s1669_s13 + $0xe0] sm:$0xff] %v586_v23  ;;  %v589_v31 = vadd.f32 %v573_v30, %v557_v29  ;;  %603 = vst [vmem:[%s1669_s13 + $0xe8] sm:$0xff] %v587_v27 }
 0x245   : > { %604 = vst [vmem:[%s1669_s13 + $0xf0] sm:$0xff] %v588_v28  ;;  %p1430_p4 = pnand %p1429_p2, %p1423_p11 }
 0x246   : > { %605 = vst [vmem:[%s1669_s13 + $0xf8] sm:$0xff] %v589_v31 }
 0x247   : > { %1433 = shalt.err (!%p1430_p4)
}
 0x248   : > { %s1434_s13 = scalar_lea.hbm %s2056_s25, 4096  ;;  %s1438_s10 = scalar_lea.hbm %s2165_s21, 8192 }
 0x249   : > { %p1435_p6 = scmp.ne.s32.totalorder %s2056_s25, %s1434_s13  ;;  %p1439_p10 = scmp.lt.u32.totalorder %s2056_s25, %s2165_s21 }
 0x24a   : > { %p1440_p12 = scmp.lt.u32.totalorder %s1438_s10, %s1434_s13  ;;  %p1442_p3 = scmp.lt.u32.totalorder %s1434_s13, %s2056_s25 }
 0x24b   : > { %p1436_p8 = pnand %p1435_p6, %p2167_p5 }
 0x24c   : > { %p1441_p1 = por %p1440_p12, %p1439_p10 }
 0x24d   : > { %p1437_p9 = pneg %p1436_p8 }
 0x24e   : > { %p1443_p7 = por %p1442_p3, %p1441_p1 }
 0x250   : > { %p1444_p11 = pnand %p1443_p7, %p1437_p9 }
 0x252   : > { %1447 = shalt.err (!%p1444_p11)
}
 0x253   : > { %s1536_s9 = smov 512   ;;  %s1537_s16 = smov 32  }
 0x254   : > { %911 = dma.vmem_to_hbm [thread:$0]  (%p2167_p5), %s2058_s29, 4096, %s2056_s25, %s2066_s0, %s1536_s9, %s1536_s9, %s1537_s16  }
 0x255 PF: > { %s2168_s24 = sld [smem:[#allocation36_spill]]  ;;  %s2169_s4 = sld [smem:[#allocation31_spill]] }
 0x256   : > { %s2170_s15 = sld [smem:[#allocation39_spill]] }
 0x25b   : > { %p923_p13 = scmp.ge.s32.totalorder %s2168_s24, 2  ;;  %s638_s8 = sand.u32 1, %s2169_s4  }
 0x25c   : > { %p2171_p0 = scmp.ne.s32.totalorder %s2170_s15, 0  ;;  %s639_s7 = scalar_lea.sflag [#allocation8], %s638_s8 }
 0x25e   : > { %p918_p2 = pnand %p923_p13, %p2171_p0 }
 0x260   : > { %1491 = dma.done.wait (!%p918_p2), %s639_s7, 4096  }
 0x261   : > { %1493 = vsyncadd (!%p918_p2), %s639_s7, 4294963200  ;;  %s21_s27 = sadd.s32 1, %s2168_s24   ;;  %s2172_s22 = sld [smem:[#allocation32_spill]] }
 0x262   : > { %p18_p4 = scmp.ge.s32.totalorder %s21_s27, 4   ;;  %s2173_s23 = sld [smem:[#allocation33_spill]] }
 0x263   : > { %s2174_s24 = sld [smem:[#allocation40_spill]]  ;;  %s2175_s25 = sld [smem:[#allocation35_spill]] }
 0x264   : > { %s2176_s26 = sld [smem:[#allocation37_spill]]  ;;  %20 = sbr.rel (!%p18_p4) target bundleno = 18 (0x12), region = 134 }
 0x26b   :  { %644 = vsyncpa [#allocation7], 1 }
 0x26c   :  { %646 = vsyncpa [#allocation7 + $0x1], 1 }
 0x26d   :  { %647 = vsyncpa [#allocation8], 1 }
 0x26e   :  { %649 = vsyncpa [#allocation8 + $0x1], 1 }
 0x26f   :  { %650 = vsyncmov [#allocation3] }
 0x272   :  { %s651_s28 = vpop.sfrf %650 }
 0x273   :  { %p904_p5 = scmp.ne.s32.totalorder %s651_s28, 0 }
 0x275   :  { %655 = shalt.err (%p904_p5)  }
 0x276   :  { %657 = vsyncmov [#allocation3 + $0x1] }
 0x279   :  { %s658_s18 = vpop.sfrf %657 }
 0x27a   :  { %p905_p6 = scmp.ne.s32.totalorder %s658_s18, 0 }
 0x27c   :  { %662 = shalt.err (%p905_p6)  }

</bundles_post_ra>
